<compile_context>
chip_gen: v5e
topology: v5e:2x2
jax: 0.10.0
libtpu: 0.0.40
codegen_flags: <defaults>
</compile_context>

<pallas_src>
from functools import partial, lru_cache

import jax
import jax.numpy as jnp
from jax.experimental import pallas as pl
from jax.experimental.pallas import tpu as pltpu


# ----------------------------- sizing helpers --------------------------------

def _round_up(x, m):
    return ((x + m - 1) // m) * m


@lru_cache(maxsize=None)
def _vmem_limit():
    """Generation-aware VMEM budget: 32 MiB safe fallback (fits v7x's 64 MiB phys),
    raised to 64 MiB on v5e/v6e (128 MiB phys) when the hardware query succeeds."""
    limit = 32 * 1024 * 1024
    try:
        cap = getattr(pltpu.get_tpu_info(), "vmem_capacity_bytes", None)
        if cap:
            limit = max(limit, min(int(cap) // 2, 64 * 1024 * 1024))
    except Exception:
        pass
    return limit


def _choose_tm(M):
    """Row tile for the M (=B*T) axis. Never a huge single full-M block:
    small M -> one sublane-aligned block, large M -> 128-row tiles (caller pads)."""
    for c in (512, 256, 128):
        if M % c == 0:
            return c
    if M < 512:
        return _round_up(M, 8)
    return 128


def _pick_tile(dim, candidates):
    """N/K tiles: largest evenly dividing candidate, else the full dim (only hit by
    small / odd dims like C*patch*patch, where a single block is safe)."""
    for c in candidates:
        if dim % c == 0:
            return c
    return dim


def _pad_rows(x, rows):
    if x.shape[0] == rows:
        return x
    return jnp.pad(x, ((0, rows - x.shape[0]),) + ((0, 0),) * (x.ndim - 1))


def _gelu_exact(x):
    """torch.nn.GELU default (exact erf). erf via Abramowitz&Stegun 7.1.26
    (|err| < 1.5e-7, below bf16 resolution) built only from exp/mul/add/where,
    which always lower on Mosaic."""
    a1, a2, a3, a4, a5 = 0.254829592, -0.284496736, 1.421413741, -1.453152027, 1.061405429
    z = x * 0.7071067811865476
    az = jnp.abs(z)
    t = 1.0 / (1.0 + 0.3275911 * az)
    poly = ((((a5 * t + a4) * t + a3) * t + a2) * t + a1) * t
    erf_abs = 1.0 - poly * jnp.exp(-az * az)
    erf = jnp.where(z >= 0, erf_abs, -erf_abs)
    return 0.5 * x * (1.0 + erf)


# ----------------- tiled matmul kernels (MXU, bf16 in / f32 acc) -------------

def _matmul_kernel(x_ref, w_ref, b_ref, o_ref, acc_ref, *, activation):
    @pl.when(pl.program_id(2) == 0)
    def _():
        acc_ref[...] = jnp.zeros_like(acc_ref)

    acc_ref[...] += jnp.dot(x_ref[...], w_ref[...],
                            preferred_element_type=jnp.float32)

    @pl.when(pl.program_id(2) == pl.num_programs(2) - 1)
    def _():
        y = acc_ref[...] + b_ref[...]
        if activation == "gelu":
            y = _gelu_exact(y)
        o_ref[...] = y.astype(o_ref.dtype)


def _matmul_ls_res_kernel(x_ref, w_ref, b_ref, ls_ref, res_ref, o_ref, acc_ref):
    @pl.when(pl.program_id(2) == 0)
    def _():
        acc_ref[...] = jnp.zeros_like(acc_ref)

    acc_ref[...] += jnp.dot(x_ref[...], w_ref[...],
                            preferred_element_type=jnp.float32)

    @pl.when(pl.program_id(2) == pl.num_programs(2) - 1)
    def _():
        y = acc_ref[...] + b_ref[...]
        y = res_ref[...].astype(jnp.float32) + ls_ref[...] * y
        o_ref[...] = y.astype(o_ref.dtype)


def linear(x, w, b, activation=None):
    """x:[M,K] @ w:[K,N] + b[N] (optional fused exact GELU). bf16 MXU, f32 acc."""
    x = x.astype(jnp.bfloat16)
    w = w.astype(jnp.bfloat16)
    M, K = x.shape
    N = w.shape[1]
    tm = _choose_tm(M)
    Mp = _round_up(M, tm)
    tn = _pick_tile(N, (512, 256, 128))
    tk = _pick_tile(K, (1024, 512, 256))
    xp = _pad_rows(x, Mp)
    out = pl.pallas_call(
        partial(_matmul_kernel, activation=activation),
        out_shape=jax.ShapeDtypeStruct((Mp, N), jnp.bfloat16),
        grid=(Mp // tm, N // tn, K // tk),
        in_specs=[
            pl.BlockSpec((tm, tk), lambda i, j, k: (i, k)),
            pl.BlockSpec((tk, tn), lambda i, j, k: (k, j)),
            pl.BlockSpec((1, tn), lambda i, j, k: (0, j)),
        ],
        out_specs=pl.BlockSpec((tm, tn), lambda i, j, k: (i, j)),
        scratch_shapes=[pltpu.VMEM((tm, tn), jnp.float32)],
        compiler_params=pltpu.CompilerParams(
            dimension_semantics=("parallel", "parallel", "arbitrary"),
            vmem_limit_bytes=_vmem_limit()),
    )(xp, w, b.reshape(1, N).astype(jnp.float32))
    return out if Mp == M else out[:M]


def linear_ls_res(x, w, b, ls, res):
    """res + ls * (x @ w + b): proj/fc2 matmul with fused LayerScale + residual."""
    x = x.astype(jnp.bfloat16)
    w = w.astype(jnp.bfloat16)
    res = res.astype(jnp.bfloat16)
    M, K = x.shape
    N = w.shape[1]
    tm = _choose_tm(M)
    Mp = _round_up(M, tm)
    tn = _pick_tile(N, (512, 256, 128))
    tk = _pick_tile(K, (1024, 512, 256))
    xp = _pad_rows(x, Mp)
    resp = _pad_rows(res, Mp)
    out = pl.pallas_call(
        _matmul_ls_res_kernel,
        out_shape=jax.ShapeDtypeStruct((Mp, N), jnp.bfloat16),
        grid=(Mp // tm, N // tn, K // tk),
        in_specs=[
            pl.BlockSpec((tm, tk), lambda i, j, k: (i, k)),
            pl.BlockSpec((tk, tn), lambda i, j, k: (k, j)),
            pl.BlockSpec((1, tn), lambda i, j, k: (0, j)),
            pl.BlockSpec((1, tn), lambda i, j, k: (0, j)),
            pl.BlockSpec((tm, tn), lambda i, j, k: (i, j)),
        ],
        out_specs=pl.BlockSpec((tm, tn), lambda i, j, k: (i, j)),
        scratch_shapes=[pltpu.VMEM((tm, tn), jnp.float32)],
        compiler_params=pltpu.CompilerParams(
            dimension_semantics=("parallel", "parallel", "arbitrary"),
            vmem_limit_bytes=_vmem_limit()),
    )(xp, w, b.reshape(1, N).astype(jnp.float32),
      ls.reshape(1, N).astype(jnp.float32), resp)
    return out if Mp == M else out[:M]


# ---------------- fused LayerNorm -> matmul (qkv / fc1 prologue) -------------

def _ln_matmul_kernel(x_ref, g_ref, b_ref, w_ref, bias_ref, o_ref, h_ref,
                      *, eps, activation):
    # LayerNorm of the resident x row-panel computed once per row tile (j == 0),
    # kept as bf16 in VMEM scratch and reused across every N block.
    @pl.when(pl.program_id(1) == 0)
    def _():
        x = x_ref[...].astype(jnp.float32)
        mean = jnp.mean(x, axis=-1, keepdims=True)
        xc = x - mean
        var = jnp.mean(xc * xc, axis=-1, keepdims=True)
        h = xc * jax.lax.rsqrt(var + eps) * g_ref[...] + b_ref[...]
        h_ref[...] = h.astype(jnp.bfloat16)

    y = jnp.dot(h_ref[...], w_ref[...], preferred_element_type=jnp.float32)
    y = y + bias_ref[...]
    if activation == "gelu":
        y = _gelu_exact(y)
    o_ref[...] = y.astype(o_ref.dtype)


def ln_linear(x, gamma, beta, w, b, activation=None, eps=1e-6):
    """LayerNorm(x) @ w + b with the LN fused into the matmul prologue (K = D as a
    single block, x row-panel resident across the N axis)."""
    x = x.astype(jnp.bfloat16)
    w = w.astype(jnp.bfloat16)
    M, D = x.shape
    N = w.shape[1]
    tm = _choose_tm(M)
    Mp = _round_up(M, tm)
    tn = _pick_tile(N, (512, 256, 128))
    xp = _pad_rows(x, Mp)
    out = pl.pallas_call(
        partial(_ln_matmul_kernel, eps=eps, activation=activation),
        out_shape=jax.ShapeDtypeStruct((Mp, N), jnp.bfloat16),
        grid=(Mp // tm, N // tn),
        in_specs=[
            pl.BlockSpec((tm, D), lambda i, j: (i, 0)),
            pl.BlockSpec((1, D), lambda i, j: (0, 0)),
            pl.BlockSpec((1, D), lambda i, j: (0, 0)),
            pl.BlockSpec((D, tn), lambda i, j: (0, j)),
            pl.BlockSpec((1, tn), lambda i, j: (0, j)),
        ],
        out_specs=pl.BlockSpec((tm, tn), lambda i, j: (i, j)),
        scratch_shapes=[pltpu.VMEM((tm, D), jnp.bfloat16)],
        compiler_params=pltpu.CompilerParams(
            # j must be "arbitrary": the LN scratch is initialized at j == 0.
            dimension_semantics=("parallel", "arbitrary"),
            vmem_limit_bytes=_vmem_limit()),
    )(xp, gamma.reshape(1, D).astype(jnp.float32),
      beta.reshape(1, D).astype(jnp.float32), w,
      b.reshape(1, N).astype(jnp.float32))
    return out if Mp == M else out[:M]


# ----------------------- standalone layernorm (final norm) -------------------

def _layernorm_kernel(x_ref, g_ref, b_ref, o_ref, *, eps):
    x = x_ref[...].astype(jnp.float32)
    mean = jnp.mean(x, axis=-1, keepdims=True)
    xc = x - mean
    var = jnp.mean(xc * xc, axis=-1, keepdims=True)
    y = xc * jax.lax.rsqrt(var + eps)
    o_ref[...] = (y * g_ref[...] + b_ref[...]).astype(o_ref.dtype)


def layernorm(x, gamma, beta, eps=1e-6, out_dtype=jnp.bfloat16):
    """x: [M, D]. DINOv2 uses eps=1e-6. Row-tiled streaming kernel."""
    M, D = x.shape
    tm = _choose_tm(M)
    Mp = _round_up(M, tm)
    xp = _pad_rows(x, Mp)
    out = pl.pallas_call(
        partial(_layernorm_kernel, eps=eps),
        out_shape=jax.ShapeDtypeStruct((Mp, D), out_dtype),
        grid=(Mp // tm,),
        in_specs=[
            pl.BlockSpec((tm, D), lambda i: (i, 0)),
            pl.BlockSpec((1, D), lambda i: (0, 0)),
            pl.BlockSpec((1, D), lambda i: (0, 0)),
        ],
        out_specs=pl.BlockSpec((tm, D), lambda i: (i, 0)),
        compiler_params=pltpu.CompilerParams(
            dimension_semantics=("parallel",),
            vmem_limit_bytes=_vmem_limit()),
    )(xp, gamma.reshape(1, D).astype(jnp.float32),
      beta.reshape(1, D).astype(jnp.float32))
    return out if Mp == M else out[:M]


# ------------------- multi-head attention: (batch, head) grid ----------------

def _attn_kernel(q_ref, k_ref, v_ref, o_ref):
    q = q_ref[0, 0]                                     # [T, dh] bf16 (pre-scaled)
    k = k_ref[0, 0]
    v = v_ref[0, 0]
    s = jax.lax.dot_general(q, k, (((1,), (1,)), ((), ())),
                            preferred_element_type=jnp.float32)   # [T, T]
    m = jnp.max(s, axis=-1, keepdims=True)
    p = jnp.exp(s - m)
    l = jnp.sum(p, axis=-1, keepdims=True)
    o = jax.lax.dot_general(p.astype(jnp.bfloat16), v, (((1,), (0,)), ((), ())),
                            preferred_element_type=jnp.float32)   # [T, dh]
    o_ref[0, 0] = (o / l).astype(o_ref.dtype)           # exact softmax denominator


def attention(qkv, heads):
    """qkv: [B, T, 3*D] with the last axis laid out as (3, H, dh) (torch qkv order).
    The 1/sqrt(dh) scale is already folded into the q projection weights.
    Returns softmax(q k^T) v with heads merged back -> [B, T, D] bf16."""
    B, T, threeD = qkv.shape
    D = threeD // 3
    dh = D // heads
    # head split as an XLA transpose (one HBM pass) -> lane-clean [B, H, T, dh] blocks
    qkv5 = qkv.astype(jnp.bfloat16).reshape(B, T, 3, heads, dh).transpose(2, 0, 3, 1, 4)
    q, k, v = qkv5[0], qkv5[1], qkv5[2]
    # TODO(synk): for very long sequences (518px DINOv2, T~1371) switch to a
    # flash-style online-softmax kernel with a KV grid axis to bound the [T,T] scores.
    # TODO(synk): process 2 heads per grid step when dh==64 for 128-lane-dense tiles.
    out = pl.pallas_call(
        _attn_kernel,
        out_shape=jax.ShapeDtypeStruct((B, heads, T, dh), jnp.bfloat16),
        grid=(B, heads),
        in_specs=[
            pl.BlockSpec((1, 1, T, dh), lambda b, h: (b, h, 0, 0)),
            pl.BlockSpec((1, 1, T, dh), lambda b, h: (b, h, 0, 0)),
            pl.BlockSpec((1, 1, T, dh), lambda b, h: (b, h, 0, 0)),
        ],
        out_specs=pl.BlockSpec((1, 1, T, dh), lambda b, h: (b, h, 0, 0)),
        compiler_params=pltpu.CompilerParams(
            dimension_semantics=("parallel", "parallel"),   # both TCs on v7x
            vmem_limit_bytes=_vmem_limit()),
    )(q, k, v)
    return out.transpose(0, 2, 1, 3).reshape(B, T, D)


# ------------------------------ ViT (DINOv2-ish) ----------------------------

def init_params(key, *, in_chans, patch, dim, depth, heads, mlp_ratio, n_patches):
    del heads  # head count only affects the forward split, not parameter shapes
    ks = jax.random.split(key, 3 + depth)

    def nrm(k, shape, scale=0.02):
        # matmul weights stored bf16 (MXU operand dtype); everything else f32
        return (scale * jax.random.normal(k, shape, jnp.float32)).astype(jnp.bfloat16)

    hidden = dim * mlp_ratio
    params = {
        "patch_w": nrm(ks[0], (in_chans * patch * patch, dim)),   # conv as matmul
        "patch_b": jnp.zeros((dim,), jnp.float32),
        "cls_token": 0.02 * jax.random.normal(ks[1], (1, 1, dim), jnp.float32),
        "pos_embed": 0.02 * jax.random.normal(ks[2], (1, 1 + n_patches, dim), jnp.float32),
        "norm_g": jnp.ones((dim,), jnp.float32),                  # final norm
        "norm_b": jnp.zeros((dim,), jnp.float32),
        "blocks": [],
    }
    for i in range(depth):
        bk = jax.random.split(ks[3 + i], 4)
        params["blocks"].append({
            "n1_g": jnp.ones((dim,), jnp.float32),
            "n1_b": jnp.zeros((dim,), jnp.float32),
            "w_qkv": nrm(bk[0], (dim, 3 * dim)),    # columns laid out as (3, H, dh)
            "b_qkv": jnp.zeros((3 * dim,), jnp.float32),
            "w_proj": nrm(bk[1], (dim, dim)),
            "b_proj": jnp.zeros((dim,), jnp.float32),
            "ls1": 0.1 * jnp.ones((dim,), jnp.float32),           # LayerScale
            "n2_g": jnp.ones((dim,), jnp.float32),
            "n2_b": jnp.zeros((dim,), jnp.float32),
            "w_fc1": nrm(bk[2], (dim, hidden)),
            "b_fc1": jnp.zeros((hidden,), jnp.float32),
            "w_fc2": nrm(bk[3], (hidden, dim)),
            "b_fc2": jnp.zeros((dim,), jnp.float32),
            "ls2": 0.1 * jnp.ones((dim,), jnp.float32),
        })
    return params


def patchify(images, patch):
    """NCHW -> [B, n_patches, C*patch*patch] in (C, ph, pw) flatten order (matches
    torch Conv2d weight flattening), patches ordered row-major like conv+flatten."""
    B, C, H, W = images.shape
    ph, pw = H // patch, W // patch
    x = images.reshape(B, C, ph, patch, pw, patch)
    x = x.transpose(0, 2, 4, 1, 3, 5).reshape(B, ph * pw, C * patch * patch)
    return x


def vit_block(x2p, p, heads, B, T):
    """x2p: [Mp, D] row-padded residual stream (bf16); pad rows stay inert/finite."""
    Mp, D = x2p.shape
    M = B * T

    # fold 1/sqrt(dh) into the q columns of the qkv projection (exact in bf16 for
    # power-of-two dh) -> no per-head scale/cast passes inside the attention kernel
    scale = float(D // heads) ** -0.5
    w_qkv = jnp.concatenate([p["w_qkv"][:, :D] * scale, p["w_qkv"][:, D:]], axis=1)
    b_qkv = jnp.concatenate([p["b_qkv"][:D] * scale, p["b_qkv"][D:]], axis=0)

    # --- attention branch: fused LN+qkv matmul, (batch, head) attention grid ---
    qkv = ln_linear(x2p, p["n1_g"], p["n1_b"], w_qkv, b_qkv)          # [Mp, 3D]
    a = attention(qkv[:M].reshape(B, T, 3 * D), heads)                 # [B, T, D]
    a = _pad_rows(a.reshape(M, D), Mp)
    x2p = linear_ls_res(a, p["w_proj"], p["b_proj"], p["ls1"], x2p)

    # --- MLP branch: fused LN+fc1+exact GELU, fused LayerScale+residual in fc2 ---
    h = ln_linear(x2p, p["n2_g"], p["n2_b"], p["w_fc1"], p["b_fc1"], activation="gelu")
    x2p = linear_ls_res(h, p["w_fc2"], p["b_fc2"], p["ls2"], x2p)
    return x2p


def get_intermediate_layers(images, params, *, patch, heads, n_last_blocks):
    """Equivalent of DINOv2 get_intermediate_layers(..., return_class_token=True, norm=True)."""
    B = images.shape[0]
    D = params["patch_w"].shape[1]

    # patch embed (Conv2d stride=kernel=patch, expressed as im2col + Pallas matmul)
    cols = patchify(images, patch)                                # [B, N, C*p*p]
    N = cols.shape[1]
    tok = linear(cols.reshape(B * N, -1), params["patch_w"], params["patch_b"])
    tok = tok.reshape(B, N, D).astype(jnp.float32)

    # prepend cls token, add positional embedding (tiny glue, plain JAX)
    cls = jnp.broadcast_to(params["cls_token"], (B, 1, D))
    x = jnp.concatenate([cls, tok], axis=1) + params["pos_embed"]
    T = N + 1
    M = B * T

    # pad the residual stream rows ONCE to a tile multiple; all row-wise kernels then
    # run without further pad/strip, only the attention reshape slices back to B*T rows
    Mp = _round_up(M, _choose_tm(M))
    x2p = _pad_rows(x.reshape(M, D).astype(jnp.bfloat16), Mp)

    depth = len(params["blocks"])
    take = set(range(depth - n_last_blocks, depth))
    outputs = []
    for i, bp in enumerate(params["blocks"]):
        x2p = vit_block(x2p, bp, heads, B, T)
        if i in take:
            outputs.append(x2p)

    # final norm applied to each selected output, then split (patches, cls)
    feats = []
    for out in outputs:
        out_n = layernorm(out, params["norm_g"], params["norm_b"],
                          out_dtype=jnp.float32)[:M].reshape(B, T, D)
        feats.append((out_n[:, 1:], out_n[:, 0]))
    return tuple(feats)


def model_with_intermediate_layers(images, params, *, patch, heads, n_last_blocks):
    # autocast_ctx is emulated by bf16 activations/weights with f32 MXU accumulation.
    # feature_model.eval() => dropout/droppath are identity, nothing to do.
    return get_intermediate_layers(images, params, patch=patch, heads=heads,
                                   n_last_blocks=n_last_blocks)


# ----------------------------------- main -----------------------------------

if __name__ == "__main__":
    B, C, H, W = 2, 3, 16, 16
    PATCH, DIM, DEPTH, HEADS, MLP_RATIO = 4, 32, 4, 2, 4
    N_LAST_BLOCKS = 2
    n_patches = (H // PATCH) * (W // PATCH)

    key = jax.random.PRNGKey(0)
    k_img, k_par = jax.random.split(key)
    images = jax.random.normal(k_img, (B, C, H, W), jnp.float32)
    params = init_params(k_par, in_chans=C, patch=PATCH, dim=DIM, depth=DEPTH,
                         heads=HEADS, mlp_ratio=MLP_RATIO, n_patches=n_patches)

    fwd = jax.jit(partial(model_with_intermediate_layers, patch=PATCH,
                          heads=HEADS, n_last_blocks=N_LAST_BLOCKS))
    feats = fwd(images, params)
    feats = jax.block_until_ready(feats)

    assert len(feats) == N_LAST_BLOCKS
    for patch_tok, cls_tok in feats:
        assert patch_tok.shape == (B, n_patches, DIM)
        assert cls_tok.shape == (B, DIM)
        assert jnp.all(jnp.isfinite(patch_tok)) and jnp.all(jnp.isfinite(cls_tok))

    print("KERNEL_OK")
</pallas_src>

<mosaic_0001>
module attributes {stable_mosaic.version = 11 : i64} {
  func.func @_matmul_kernel(%arg0: i32, %arg1: i32, %arg2: i32, %arg3: memref<32x48xbf16, #tpu.memory_space<vmem>>, %arg4: memref<48x32xbf16, #tpu.memory_space<vmem>>, %arg5: memref<1x32xf32, #tpu.memory_space<vmem>>, %arg6: memref<32x32xbf16, #tpu.memory_space<vmem>>, %arg7: memref<32x32xf32, #tpu.memory_space<vmem>>) attributes {dimension_semantics = [#tpu.dimension_semantics<parallel>, #tpu.dimension_semantics<parallel>, #tpu.dimension_semantics<arbitrary>], iteration_bounds = array<i64: 1, 1, 1>, scalar_prefetch = 0 : i64, scratch_operands = 1 : i64, tpu.core_type = #tpu.core_type<tc>, window_params = [{transform_indices = @transform_0, window_bounds = array<i64: 32, 48>}, {transform_indices = @transform_1, window_bounds = array<i64: 48, 32>}, {transform_indices = @transform_2, window_bounds = array<i64: 1, 32>}, {transform_indices = @transform_3, window_bounds = array<i64: 32, 32>}]} {
    %c0_i32 = arith.constant 0 : i32
    %0 = arith.cmpi eq, %arg2, %c0_i32 : i32
    %1 = arith.extui %0 : i1 to i32
    %c0_i32_0 = arith.constant 0 : i32
    %2 = arith.cmpi ne, %1, %c0_i32_0 : i32
    scf.if %2 {
      %cst_10 = arith.constant 0.000000e+00 : f32
      %12 = vector.broadcast %cst_10 : f32 to vector<32x32xf32>
      %c0_11 = arith.constant 0 : index
      %c0_12 = arith.constant 0 : index
      %13 = vector.load %arg7[%c0_11, %c0_12] : memref<32x32xf32, #tpu.memory_space<vmem>>, vector<32x32xf32>
      tpu.vector_store %arg7[%c0_11, %c0_12], %12 {strides = array<i32>} : memref<32x32xf32, #tpu.memory_space<vmem>>, vector<32x32xf32>,
    } else {
    }
    %c0 = arith.constant 0 : index
    %c0_1 = arith.constant 0 : index
    %3 = vector.load %arg7[%c0, %c0_1] : memref<32x32xf32, #tpu.memory_space<vmem>>, vector<32x32xf32>
    %c0_2 = arith.constant 0 : index
    %c0_3 = arith.constant 0 : index
    %4 = vector.load %arg3[%c0_2, %c0_3] : memref<32x48xbf16, #tpu.memory_space<vmem>>, vector<32x48xbf16>
    %c0_4 = arith.constant 0 : index
    %c0_5 = arith.constant 0 : index
    %5 = vector.load %arg4[%c0_4, %c0_5] : memref<48x32xbf16, #tpu.memory_space<vmem>>, vector<48x32xbf16>
    %cst = arith.constant dense<0.000000e+00> : vector<32x32xf32>
    %6 = tpu.matmul %4, %5, %cst {dimension_numbers = #tpu.dot_dimension_numbers<[1], [0], [0], [1], [0, 0, 1, 1], [], []>} : vector<32x48xbf16>, vector<48x32xbf16>, vector<32x32xf32> -> vector<32x32xf32>
    %7 = arith.addf %3, %6 : vector<32x32xf32>
    %c0_6 = arith.constant 0 : index
    %c0_7 = arith.constant 0 : index
    %8 = vector.load %arg7[%c0_6, %c0_7] : memref<32x32xf32, #tpu.memory_space<vmem>>, vector<32x32xf32>
    tpu.vector_store %arg7[%c0_6, %c0_7], %7 {strides = array<i32>} : memref<32x32xf32, #tpu.memory_space<vmem>>, vector<32x32xf32>,
    %c0_i32_8 = arith.constant 0 : i32
    %9 = arith.cmpi eq, %arg2, %c0_i32_8 : i32
    %10 = arith.extui %9 : i1 to i32
    %c0_i32_9 = arith.constant 0 : i32
    %11 = arith.cmpi ne, %10, %c0_i32_9 : i32
    scf.if %11 {
      %c0_10 = arith.constant 0 : index
      %c0_11 = arith.constant 0 : index
      %12 = vector.load %arg7[%c0_10, %c0_11] : memref<32x32xf32, #tpu.memory_space<vmem>>, vector<32x32xf32>
      %c0_12 = arith.constant 0 : index
      %c0_13 = arith.constant 0 : index
      %13 = vector.load %arg5[%c0_12, %c0_13] : memref<1x32xf32, #tpu.memory_space<vmem>>, vector<1x32xf32>
      %14 = vector.broadcast %13 : vector<1x32xf32> to vector<32x32xf32>
      %15 = arith.addf %12, %14 : vector<32x32xf32>
      %16 = arith.truncf %15 : vector<32x32xf32> to vector<32x32xbf16>
      %c0_14 = arith.constant 0 : index
      %c0_15 = arith.constant 0 : index
      %17 = vector.load %arg6[%c0_14, %c0_15] : memref<32x32xbf16, #tpu.memory_space<vmem>>, vector<32x32xbf16>
      tpu.vector_store %arg6[%c0_14, %c0_15], %16 {strides = array<i32>} : memref<32x32xbf16, #tpu.memory_space<vmem>>, vector<32x32xbf16>,
    } else {
    }
    return
  }
  func.func @transform_0(%arg0: i32, %arg1: i32, %arg2: i32) -> (i32, i32) {
    %c0_i32 = arith.constant 0 : i32
    return %arg0, %arg2 : i32, i32
  }
  func.func @transform_1(%arg0: i32, %arg1: i32, %arg2: i32) -> (i32, i32) {
    %c0_i32 = arith.constant 0 : i32
    return %arg2, %arg1 : i32, i32
  }
  func.func @transform_2(%arg0: i32, %arg1: i32, %arg2: i32) -> (i32, i32) {
    %c0_i32 = arith.constant 0 : i32
    %c0_i32_0 = arith.constant 0 : i32
    return %c0_i32, %arg1 : i32, i32
  }
  func.func @transform_3(%arg0: i32, %arg1: i32, %arg2: i32) -> (i32, i32) {
    %c0_i32 = arith.constant 0 : i32
    return %arg0, %arg1 : i32, i32
  }
}

module attributes {stable_mosaic.version = 11 : i64} {
  func.func @_ln_matmul_kernel(%arg0: i32, %arg1: i32, %arg2: memref<40x32xbf16, #tpu.memory_space<vmem>>, %arg3: memref<1x32xf32, #tpu.memory_space<vmem>>, %arg4: memref<1x32xf32, #tpu.memory_space<vmem>>, %arg5: memref<32x96xbf16, #tpu.memory_space<vmem>>, %arg6: memref<1x96xf32, #tpu.memory_space<vmem>>, %arg7: memref<40x96xbf16, #tpu.memory_space<vmem>>, %arg8: memref<40x32xbf16, #tpu.memory_space<vmem>>) attributes {dimension_semantics = [#tpu.dimension_semantics<parallel>, #tpu.dimension_semantics<arbitrary>], iteration_bounds = array<i64: 1, 1>, scalar_prefetch = 0 : i64, scratch_operands = 1 : i64, tpu.core_type = #tpu.core_type<tc>, window_params = [{transform_indices = @transform_0, window_bounds = array<i64: 40, 32>}, {pipeline_mode = #tpu.pipeline_mode<synchronous>, transform_indices = @transform_1, window_bounds = array<i64: 1, 32>}, {pipeline_mode = #tpu.pipeline_mode<synchronous>, transform_indices = @transform_2, window_bounds = array<i64: 1, 32>}, {transform_indices = @transform_3, window_bounds = array<i64: 32, 96>}, {transform_indices = @transform_4, window_bounds = array<i64: 1, 96>}, {transform_indices = @transform_5, window_bounds = array<i64: 40, 96>}]} {
    %c0_i32 = arith.constant 0 : i32
    %0 = arith.cmpi eq, %arg1, %c0_i32 : i32
    %1 = arith.extui %0 : i1 to i32
    %c0_i32_0 = arith.constant 0 : i32
    %2 = arith.cmpi ne, %1, %c0_i32_0 : i32
    scf.if %2 {
      %c0_8 = arith.constant 0 : index
      %c0_9 = arith.constant 0 : index
      %11 = vector.load %arg2[%c0_8, %c0_9] : memref<40x32xbf16, #tpu.memory_space<vmem>>, vector<40x32xbf16>
      %12 = arith.extf %11 : vector<40x32xbf16> to vector<40x32xf32>
      %cst_10 = arith.constant dense<0.000000e+00> : vector<40xf32>
      %13 = vector.multi_reduction <add>, %12, %cst_10 [1] : vector<40x32xf32> to vector<40xf32>
      %14 = vector.shape_cast %13 : vector<40xf32> to vector<40x1xf32>
      %cst_11 = arith.constant 3.200000e+01 : f32
      %15 = vector.broadcast %cst_11 : f32 to vector<40x1xf32>
      %16 = arith.divf %14, %15 : vector<40x1xf32>
      %17 = vector.broadcast %16 : vector<40x1xf32> to vector<40x32xf32>
      %18 = arith.subf %12, %17 : vector<40x32xf32>
      %19 = arith.mulf %18, %18 : vector<40x32xf32>
      %cst_12 = arith.constant dense<0.000000e+00> : vector<40xf32>
      %20 = vector.multi_reduction <add>, %19, %cst_12 [1] : vector<40x32xf32> to vector<40xf32>
      %21 = vector.shape_cast %20 : vector<40xf32> to vector<40x1xf32>
      %cst_13 = arith.constant 3.200000e+01 : f32
      %22 = vector.broadcast %cst_13 : f32 to vector<40x1xf32>
      %23 = arith.divf %21, %22 : vector<40x1xf32>
      %cst_14 = arith.constant 9.99999997E-7 : f32
      %24 = vector.broadcast %cst_14 : f32 to vector<40x1xf32>
      %25 = arith.addf %23, %24 : vector<40x1xf32>
      %26 = math.rsqrt %25 : vector<40x1xf32>
      %27 = vector.broadcast %26 : vector<40x1xf32> to vector<40x32xf32>
      %28 = arith.mulf %18, %27 : vector<40x32xf32>
      %c0_15 = arith.constant 0 : index
      %c0_16 = arith.constant 0 : index
      %29 = vector.load %arg3[%c0_15, %c0_16] : memref<1x32xf32, #tpu.memory_space<vmem>>, vector<1x32xf32>
      %30 = vector.broadcast %29 : vector<1x32xf32> to vector<40x32xf32>
      %31 = arith.mulf %28, %30 : vector<40x32xf32>
      %c0_17 = arith.constant 0 : index
      %c0_18 = arith.constant 0 : index
      %32 = vector.load %arg4[%c0_17, %c0_18] : memref<1x32xf32, #tpu.memory_space<vmem>>, vector<1x32xf32>
      %33 = vector.broadcast %32 : vector<1x32xf32> to vector<40x32xf32>
      %34 = arith.addf %31, %33 : vector<40x32xf32>
      %35 = arith.truncf %34 : vector<40x32xf32> to vector<40x32xbf16>
      %c0_19 = arith.constant 0 : index
      %c0_20 = arith.constant 0 : index
      %36 = vector.load %arg8[%c0_19, %c0_20] : memref<40x32xbf16, #tpu.memory_space<vmem>>, vector<40x32xbf16>
      tpu.vector_store %arg8[%c0_19, %c0_20], %35 {strides = array<i32>} : memref<40x32xbf16, #tpu.memory_space<vmem>>, vector<40x32xbf16>,
    } else {
    }
    %c0 = arith.constant 0 : index
    %c0_1 = arith.constant 0 : index
    %3 = vector.load %arg8[%c0, %c0_1] : memref<40x32xbf16, #tpu.memory_space<vmem>>, vector<40x32xbf16>
    %c0_2 = arith.constant 0 : index
    %c0_3 = arith.constant 0 : index
    %4 = vector.load %arg5[%c0_2, %c0_3] : memref<32x96xbf16, #tpu.memory_space<vmem>>, vector<32x96xbf16>
    %cst = arith.constant dense<0.000000e+00> : vector<40x96xf32>
    %5 = tpu.matmul %3, %4, %cst {dimension_numbers = #tpu.dot_dimension_numbers<[1], [0], [0], [1], [0, 0, 1, 1], [], []>} : vector<40x32xbf16>, vector<32x96xbf16>, vector<40x96xf32> -> vector<40x96xf32>
    %c0_4 = arith.constant 0 : index
    %c0_5 = arith.constant 0 : index
    %6 = vector.load %arg6[%c0_4, %c0_5] : memref<1x96xf32, #tpu.memory_space<vmem>>, vector<1x96xf32>
    %7 = vector.broadcast %6 : vector<1x96xf32> to vector<40x96xf32>
    %8 = arith.addf %5, %7 : vector<40x96xf32>
    %9 = arith.truncf %8 : vector<40x96xf32> to vector<40x96xbf16>
    %c0_6 = arith.constant 0 : index
    %c0_7 = arith.constant 0 : index
    %10 = vector.load %arg7[%c0_6, %c0_7] : memref<40x96xbf16, #tpu.memory_space<vmem>>, vector<40x96xbf16>
    tpu.vector_store %arg7[%c0_6, %c0_7], %9 {strides = array<i32>} : memref<40x96xbf16, #tpu.memory_space<vmem>>, vector<40x96xbf16>,
    return
  }
  func.func @transform_0(%arg0: i32, %arg1: i32) -> (i32, i32) {
    %c0_i32 = arith.constant 0 : i32
    %c0_i32_0 = arith.constant 0 : i32
    return %arg0, %c0_i32 : i32, i32
  }
  func.func @transform_1(%arg0: i32, %arg1: i32) -> (i32, i32) {
    %c0_i32 = arith.constant 0 : i32
    %c0_i32_0 = arith.constant 0 : i32
    %c0_i32_1 = arith.constant 0 : i32
    return %c0_i32, %c0_i32_0 : i32, i32
  }
  func.func @transform_2(%arg0: i32, %arg1: i32) -> (i32, i32) {
    %c0_i32 = arith.constant 0 : i32
    %c0_i32_0 = arith.constant 0 : i32
    %c0_i32_1 = arith.constant 0 : i32
    return %c0_i32, %c0_i32_0 : i32, i32
  }
  func.func @transform_3(%arg0: i32, %arg1: i32) -> (i32, i32) {
    %c0_i32 = arith.constant 0 : i32
    %c0_i32_0 = arith.constant 0 : i32
    return %c0_i32, %arg1 : i32, i32
  }
  func.func @transform_4(%arg0: i32, %arg1: i32) -> (i32, i32) {
    %c0_i32 = arith.constant 0 : i32
    %c0_i32_0 = arith.constant 0 : i32
    return %c0_i32, %arg1 : i32, i32
  }
  func.func @transform_5(%arg0: i32, %arg1: i32) -> (i32, i32) {
    %c0_i32 = arith.constant 0 : i32
    return %arg0, %arg1 : i32, i32
  }
}

module attributes {stable_mosaic.version = 11 : i64} {
  func.func @_attn_kernel(%arg0: i32, %arg1: i32, %arg2: memref<1x1x17x16xbf16, #tpu.memory_space<vmem>>, %arg3: memref<1x1x17x16xbf16, #tpu.memory_space<vmem>>, %arg4: memref<1x1x17x16xbf16, #tpu.memory_space<vmem>>, %arg5: memref<1x1x17x16xbf16, #tpu.memory_space<vmem>>) attributes {dimension_semantics = [#tpu.dimension_semantics<parallel>, #tpu.dimension_semantics<parallel>], iteration_bounds = array<i64: 2, 2>, scalar_prefetch = 0 : i64, scratch_operands = 0 : i64, tpu.core_type = #tpu.core_type<tc>, window_params = [{transform_indices = @transform_0, window_bounds = array<i64: 1, 1, 17, 16>}, {transform_indices = @transform_1, window_bounds = array<i64: 1, 1, 17, 16>}, {transform_indices = @transform_2, window_bounds = array<i64: 1, 1, 17, 16>}, {transform_indices = @transform_3, window_bounds = array<i64: 1, 1, 17, 16>}]} {
    %c0 = arith.constant 0 : index
    %c0_0 = arith.constant 0 : index
    %c0_1 = arith.constant 0 : index
    %c0_2 = arith.constant 0 : index
    %0 = vector.load %arg2[%c0, %c0_0, %c0_1, %c0_2] : memref<1x1x17x16xbf16, #tpu.memory_space<vmem>>, vector<1x1x17x16xbf16>
    %1 = vector.shape_cast %0 : vector<1x1x17x16xbf16> to vector<17x16xbf16>
    %c0_3 = arith.constant 0 : index
    %c0_4 = arith.constant 0 : index
    %c0_5 = arith.constant 0 : index
    %c0_6 = arith.constant 0 : index
    %2 = vector.load %arg3[%c0_3, %c0_4, %c0_5, %c0_6] : memref<1x1x17x16xbf16, #tpu.memory_space<vmem>>, vector<1x1x17x16xbf16>
    %3 = vector.shape_cast %2 : vector<1x1x17x16xbf16> to vector<17x16xbf16>
    %c0_7 = arith.constant 0 : index
    %c0_8 = arith.constant 0 : index
    %c0_9 = arith.constant 0 : index
    %c0_10 = arith.constant 0 : index
    %4 = vector.load %arg4[%c0_7, %c0_8, %c0_9, %c0_10] : memref<1x1x17x16xbf16, #tpu.memory_space<vmem>>, vector<1x1x17x16xbf16>
    %5 = vector.shape_cast %4 : vector<1x1x17x16xbf16> to vector<17x16xbf16>
    %cst = arith.constant dense<0.000000e+00> : vector<17x17xf32>
    %6 = tpu.matmul %1, %3, %cst {dimension_numbers = #tpu.dot_dimension_numbers<[1], [1], [0], [0], [0, 0, 1, 0], [], []>} : vector<17x16xbf16>, vector<17x16xbf16>, vector<17x17xf32> -> vector<17x17xf32>
    %cst_11 = arith.constant dense<0xFF800000> : vector<17xf32>
    %7 = vector.multi_reduction <maximumf>, %6, %cst_11 [1] : vector<17x17xf32> to vector<17xf32>
    %8 = vector.shape_cast %7 : vector<17xf32> to vector<17x1xf32>
    %9 = vector.broadcast %8 : vector<17x1xf32> to vector<17x17xf32>
    %10 = arith.subf %6, %9 : vector<17x17xf32>
    %11 = math.exp %10 : vector<17x17xf32>
    %cst_12 = arith.constant dense<0.000000e+00> : vector<17xf32>
    %12 = vector.multi_reduction <add>, %11, %cst_12 [1] : vector<17x17xf32> to vector<17xf32>
    %13 = vector.shape_cast %12 : vector<17xf32> to vector<17x1xf32>
    %14 = arith.truncf %11 : vector<17x17xf32> to vector<17x17xbf16>
    %cst_13 = arith.constant dense<0.000000e+00> : vector<17x16xf32>
    %15 = tpu.matmul %14, %5, %cst_13 {dimension_numbers = #tpu.dot_dimension_numbers<[1], [0], [0], [1], [0, 0, 1, 1], [], []>} : vector<17x17xbf16>, vector<17x16xbf16>, vector<17x16xf32> -> vector<17x16xf32>
    %16 = vector.broadcast %13 : vector<17x1xf32> to vector<17x16xf32>
    %17 = arith.divf %15, %16 : vector<17x16xf32>
    %18 = arith.truncf %17 : vector<17x16xf32> to vector<17x16xbf16>
    %c0_14 = arith.constant 0 : index
    %c0_15 = arith.constant 0 : index
    %c0_16 = arith.constant 0 : index
    %c0_17 = arith.constant 0 : index
    %19 = vector.load %arg5[%c0_14, %c0_15, %c0_16, %c0_17] : memref<1x1x17x16xbf16, #tpu.memory_space<vmem>>, vector<1x1x17x16xbf16>
    %20 = vector.shape_cast %19 : vector<1x1x17x16xbf16> to vector<17x16xbf16>
    %21 = vector.shape_cast %18 : vector<17x16xbf16> to vector<1x1x17x16xbf16>
    tpu.vector_store %arg5[%c0_14, %c0_15, %c0_16, %c0_17], %21 {strides = array<i32>} : memref<1x1x17x16xbf16, #tpu.memory_space<vmem>>, vector<1x1x17x16xbf16>,
    return
  }
  func.func @transform_0(%arg0: i32, %arg1: i32) -> (i32, i32, i32, i32) {
    %c0_i32 = arith.constant 0 : i32
    %c0_i32_0 = arith.constant 0 : i32
    %c0_i32_1 = arith.constant 0 : i32
    return %arg0, %arg1, %c0_i32, %c0_i32_0 : i32, i32, i32, i32
  }
  func.func @transform_1(%arg0: i32, %arg1: i32) -> (i32, i32, i32, i32) {
    %c0_i32 = arith.constant 0 : i32
    %c0_i32_0 = arith.constant 0 : i32
    %c0_i32_1 = arith.constant 0 : i32
    return %arg0, %arg1, %c0_i32, %c0_i32_0 : i32, i32, i32, i32
  }
  func.func @transform_2(%arg0: i32, %arg1: i32) -> (i32, i32, i32, i32) {
    %c0_i32 = arith.constant 0 : i32
    %c0_i32_0 = arith.constant 0 : i32
    %c0_i32_1 = arith.constant 0 : i32
    return %arg0, %arg1, %c0_i32, %c0_i32_0 : i32, i32, i32, i32
  }
  func.func @transform_3(%arg0: i32, %arg1: i32) -> (i32, i32, i32, i32) {
    %c0_i32 = arith.constant 0 : i32
    %c0_i32_0 = arith.constant 0 : i32
    %c0_i32_1 = arith.constant 0 : i32
    return %arg0, %arg1, %c0_i32, %c0_i32_0 : i32, i32, i32, i32
  }
}

module attributes {stable_mosaic.version = 11 : i64} {
  func.func @_ln_matmul_kernel(%arg0: i32, %arg1: i32, %arg2: memref<40x32xbf16, #tpu.memory_space<vmem>>, %arg3: memref<1x32xf32, #tpu.memory_space<vmem>>, %arg4: memref<1x32xf32, #tpu.memory_space<vmem>>, %arg5: memref<32x128xbf16, #tpu.memory_space<vmem>>, %arg6: memref<1x128xf32, #tpu.memory_space<vmem>>, %arg7: memref<40x128xbf16, #tpu.memory_space<vmem>>, %arg8: memref<40x32xbf16, #tpu.memory_space<vmem>>) attributes {dimension_semantics = [#tpu.dimension_semantics<parallel>, #tpu.dimension_semantics<arbitrary>], iteration_bounds = array<i64: 1, 1>, scalar_prefetch = 0 : i64, scratch_operands = 1 : i64, tpu.core_type = #tpu.core_type<tc>, window_params = [{transform_indices = @transform_0, window_bounds = array<i64: 40, 32>}, {pipeline_mode = #tpu.pipeline_mode<synchronous>, transform_indices = @transform_1, window_bounds = array<i64: 1, 32>}, {pipeline_mode = #tpu.pipeline_mode<synchronous>, transform_indices = @transform_2, window_bounds = array<i64: 1, 32>}, {transform_indices = @transform_3, window_bounds = array<i64: 32, 128>}, {transform_indices = @transform_4, window_bounds = array<i64: 1, 128>}, {transform_indices = @transform_5, window_bounds = array<i64: 40, 128>}]} {
    %c0_i32 = arith.constant 0 : i32
    %0 = arith.cmpi eq, %arg1, %c0_i32 : i32
    %1 = arith.extui %0 : i1 to i32
    %c0_i32_0 = arith.constant 0 : i32
    %2 = arith.cmpi ne, %1, %c0_i32_0 : i32
    scf.if %2 {
      %c0_23 = arith.constant 0 : index
      %c0_24 = arith.constant 0 : index
      %51 = vector.load %arg2[%c0_23, %c0_24] : memref<40x32xbf16, #tpu.memory_space<vmem>>, vector<40x32xbf16>
      %52 = arith.extf %51 : vector<40x32xbf16> to vector<40x32xf32>
      %cst_25 = arith.constant dense<0.000000e+00> : vector<40xf32>
      %53 = vector.multi_reduction <add>, %52, %cst_25 [1] : vector<40x32xf32> to vector<40xf32>
      %54 = vector.shape_cast %53 : vector<40xf32> to vector<40x1xf32>
      %cst_26 = arith.constant 3.200000e+01 : f32
      %55 = vector.broadcast %cst_26 : f32 to vector<40x1xf32>
      %56 = arith.divf %54, %55 : vector<40x1xf32>
      %57 = vector.broadcast %56 : vector<40x1xf32> to vector<40x32xf32>
      %58 = arith.subf %52, %57 : vector<40x32xf32>
      %59 = arith.mulf %58, %58 : vector<40x32xf32>
      %cst_27 = arith.constant dense<0.000000e+00> : vector<40xf32>
      %60 = vector.multi_reduction <add>, %59, %cst_27 [1] : vector<40x32xf32> to vector<40xf32>
      %61 = vector.shape_cast %60 : vector<40xf32> to vector<40x1xf32>
      %cst_28 = arith.constant 3.200000e+01 : f32
      %62 = vector.broadcast %cst_28 : f32 to vector<40x1xf32>
      %63 = arith.divf %61, %62 : vector<40x1xf32>
      %cst_29 = arith.constant 9.99999997E-7 : f32
      %64 = vector.broadcast %cst_29 : f32 to vector<40x1xf32>
      %65 = arith.addf %63, %64 : vector<40x1xf32>
      %66 = math.rsqrt %65 : vector<40x1xf32>
      %67 = vector.broadcast %66 : vector<40x1xf32> to vector<40x32xf32>
      %68 = arith.mulf %58, %67 : vector<40x32xf32>
      %c0_30 = arith.constant 0 : index
      %c0_31 = arith.constant 0 : index
      %69 = vector.load %arg3[%c0_30, %c0_31] : memref<1x32xf32, #tpu.memory_space<vmem>>, vector<1x32xf32>
      %70 = vector.broadcast %69 : vector<1x32xf32> to vector<40x32xf32>
      %71 = arith.mulf %68, %70 : vector<40x32xf32>
      %c0_32 = arith.constant 0 : index
      %c0_33 = arith.constant 0 : index
      %72 = vector.load %arg4[%c0_32, %c0_33] : memref<1x32xf32, #tpu.memory_space<vmem>>, vector<1x32xf32>
      %73 = vector.broadcast %72 : vector<1x32xf32> to vector<40x32xf32>
      %74 = arith.addf %71, %73 : vector<40x32xf32>
      %75 = arith.truncf %74 : vector<40x32xf32> to vector<40x32xbf16>
      %c0_34 = arith.constant 0 : index
      %c0_35 = arith.constant 0 : index
      %76 = vector.load %arg8[%c0_34, %c0_35] : memref<40x32xbf16, #tpu.memory_space<vmem>>, vector<40x32xbf16>
      tpu.vector_store %arg8[%c0_34, %c0_35], %75 {strides = array<i32>} : memref<40x32xbf16, #tpu.memory_space<vmem>>, vector<40x32xbf16>,
    } else {
    }
    %c0 = arith.constant 0 : index
    %c0_1 = arith.constant 0 : index
    %3 = vector.load %arg8[%c0, %c0_1] : memref<40x32xbf16, #tpu.memory_space<vmem>>, vector<40x32xbf16>
    %c0_2 = arith.constant 0 : index
    %c0_3 = arith.constant 0 : index
    %4 = vector.load %arg5[%c0_2, %c0_3] : memref<32x128xbf16, #tpu.memory_space<vmem>>, vector<32x128xbf16>
    %cst = arith.constant dense<0.000000e+00> : vector<40x128xf32>
    %5 = tpu.matmul %3, %4, %cst {dimension_numbers = #tpu.dot_dimension_numbers<[1], [0], [0], [1], [0, 0, 1, 1], [], []>} : vector<40x32xbf16>, vector<32x128xbf16>, vector<40x128xf32> -> vector<40x128xf32>
    %c0_4 = arith.constant 0 : index
    %c0_5 = arith.constant 0 : index
    %6 = vector.load %arg6[%c0_4, %c0_5] : memref<1x128xf32, #tpu.memory_space<vmem>>, vector<1x128xf32>
    %7 = vector.broadcast %6 : vector<1x128xf32> to vector<40x128xf32>
    %8 = arith.addf %5, %7 : vector<40x128xf32>
    %cst_6 = arith.constant 0.707106769 : f32
    %9 = vector.broadcast %cst_6 : f32 to vector<40x128xf32>
    %10 = arith.mulf %8, %9 : vector<40x128xf32>
    %11 = math.absf %10 : vector<40x128xf32>
    %cst_7 = arith.constant 0.327591091 : f32
    %12 = vector.broadcast %cst_7 : f32 to vector<40x128xf32>
    %13 = arith.mulf %12, %11 : vector<40x128xf32>
    %cst_8 = arith.constant 1.000000e+00 : f32
    %14 = vector.broadcast %cst_8 : f32 to vector<40x128xf32>
    %15 = arith.addf %14, %13 : vector<40x128xf32>
    %cst_9 = arith.constant 1.000000e+00 : f32
    %16 = vector.broadcast %cst_9 : f32 to vector<40x128xf32>
    %17 = arith.divf %16, %15 : vector<40x128xf32>
    %cst_10 = arith.constant 1.06140542 : f32
    %18 = vector.broadcast %cst_10 : f32 to vector<40x128xf32>
    %19 = arith.mulf %18, %17 : vector<40x128xf32>
    %cst_11 = arith.constant -1.45315206 : f32
    %20 = vector.broadcast %cst_11 : f32 to vector<40x128xf32>
    %21 = arith.addf %19, %20 : vector<40x128xf32>
    %22 = arith.mulf %21, %17 : vector<40x128xf32>
    %cst_12 = arith.constant 1.42141378 : f32
    %23 = vector.broadcast %cst_12 : f32 to vector<40x128xf32>
    %24 = arith.addf %22, %23 : vector<40x128xf32>
    %25 = arith.mulf %24, %17 : vector<40x128xf32>
    %cst_13 = arith.constant -0.284496725 : f32
    %26 = vector.broadcast %cst_13 : f32 to vector<40x128xf32>
    %27 = arith.addf %25, %26 : vector<40x128xf32>
    %28 = arith.mulf %27, %17 : vector<40x128xf32>
    %cst_14 = arith.constant 0.254829586 : f32
    %29 = vector.broadcast %cst_14 : f32 to vector<40x128xf32>
    %30 = arith.addf %28, %29 : vector<40x128xf32>
    %31 = arith.mulf %30, %17 : vector<40x128xf32>
    %cst_15 = arith.constant 0.000000e+00 : f32
    %32 = vector.broadcast %cst_15 : f32 to vector<40x128xf32>
    %33 = arith.subf %32, %11 : vector<40x128xf32>
    %34 = arith.mulf %33, %11 : vector<40x128xf32>
    %35 = math.exp %34 : vector<40x128xf32>
    %36 = arith.mulf %31, %35 : vector<40x128xf32>
    %cst_16 = arith.constant 1.000000e+00 : f32
    %37 = vector.broadcast %cst_16 : f32 to vector<40x128xf32>
    %38 = arith.subf %37, %36 : vector<40x128xf32>
    %cst_17 = arith.constant 0.000000e+00 : f32
    %39 = vector.broadcast %cst_17 : f32 to vector<40x128xf32>
    %40 = arith.cmpf oge, %10, %39 : vector<40x128xf32>
    %cst_18 = arith.constant 0.000000e+00 : f32
    %41 = vector.broadcast %cst_18 : f32 to vector<40x128xf32>
    %42 = arith.subf %41, %38 : vector<40x128xf32>
    %43 = arith.select %40, %38, %42 : vector<40x128xi1>, vector<40x128xf32>
    %cst_19 = arith.constant 5.000000e-01 : f32
    %44 = vector.broadcast %cst_19 : f32 to vector<40x128xf32>
    %45 = arith.mulf %44, %8 : vector<40x128xf32>
    %cst_20 = arith.constant 1.000000e+00 : f32
    %46 = vector.broadcast %cst_20 : f32 to vector<40x128xf32>
    %47 = arith.addf %46, %43 : vector<40x128xf32>
    %48 = arith.mulf %45, %47 : vector<40x128xf32>
    %49 = arith.truncf %48 : vector<40x128xf32> to vector<40x128xbf16>
    %c0_21 = arith.constant 0 : index
    %c0_22 = arith.constant 0 : index
    %50 = vector.load %arg7[%c0_21, %c0_22] : memref<40x128xbf16, #tpu.memory_space<vmem>>, vector<40x128xbf16>
    tpu.vector_store %arg7[%c0_21, %c0_22], %49 {strides = array<i32>} : memref<40x128xbf16, #tpu.memory_space<vmem>>, vector<40x128xbf16>,
    return
  }
  func.func @transform_0(%arg0: i32, %arg1: i32) -> (i32, i32) {
    %c0_i32 = arith.constant 0 : i32
    %c0_i32_0 = arith.constant 0 : i32
    return %arg0, %c0_i32 : i32, i32
  }
  func.func @transform_1(%arg0: i32, %arg1: i32) -> (i32, i32) {
    %c0_i32 = arith.constant 0 : i32
    %c0_i32_0 = arith.constant 0 : i32
    %c0_i32_1 = arith.constant 0 : i32
    return %c0_i32, %c0_i32_0 : i32, i32
  }
  func.func @transform_2(%arg0: i32, %arg1: i32) -> (i32, i32) {
    %c0_i32 = arith.constant 0 : i32
    %c0_i32_0 = arith.constant 0 : i32
    %c0_i32_1 = arith.constant 0 : i32
    return %c0_i32, %c0_i32_0 : i32, i32
  }
  func.func @transform_3(%arg0: i32, %arg1: i32) -> (i32, i32) {
    %c0_i32 = arith.constant 0 : i32
    %c0_i32_0 = arith.constant 0 : i32
    return %c0_i32, %arg1 : i32, i32
  }
  func.func @transform_4(%arg0: i32, %arg1: i32) -> (i32, i32) {
    %c0_i32 = arith.constant 0 : i32
    %c0_i32_0 = arith.constant 0 : i32
    return %c0_i32, %arg1 : i32, i32
  }
  func.func @transform_5(%arg0: i32, %arg1: i32) -> (i32, i32) {
    %c0_i32 = arith.constant 0 : i32
    return %arg0, %arg1 : i32, i32
  }
}

module attributes {stable_mosaic.version = 11 : i64} {
  func.func @_matmul_ls_res_kernel(%arg0: i32, %arg1: i32, %arg2: i32, %arg3: memref<40x32xbf16, #tpu.memory_space<vmem>>, %arg4: memref<32x32xbf16, #tpu.memory_space<vmem>>, %arg5: memref<1x32xf32, #tpu.memory_space<vmem>>, %arg6: memref<1x32xf32, #tpu.memory_space<vmem>>, %arg7: memref<40x32xbf16, #tpu.memory_space<vmem>>, %arg8: memref<40x32xbf16, #tpu.memory_space<vmem>>, %arg9: memref<40x32xf32, #tpu.memory_space<vmem>>) attributes {dimension_semantics = [#tpu.dimension_semantics<parallel>, #tpu.dimension_semantics<parallel>, #tpu.dimension_semantics<arbitrary>], iteration_bounds = array<i64: 1, 1, 1>, scalar_prefetch = 0 : i64, scratch_operands = 1 : i64, tpu.core_type = #tpu.core_type<tc>, window_params = [{transform_indices = @transform_0, window_bounds = array<i64: 40, 32>}, {transform_indices = @transform_1, window_bounds = array<i64: 32, 32>}, {transform_indices = @transform_2, window_bounds = array<i64: 1, 32>}, {transform_indices = @transform_3, window_bounds = array<i64: 1, 32>}, {transform_indices = @transform_4, window_bounds = array<i64: 40, 32>}, {transform_indices = @transform_5, window_bounds = array<i64: 40, 32>}]} {
    %c0_i32 = arith.constant 0 : i32
    %0 = arith.cmpi eq, %arg2, %c0_i32 : i32
    %1 = arith.extui %0 : i1 to i32
    %c0_i32_0 = arith.constant 0 : i32
    %2 = arith.cmpi ne, %1, %c0_i32_0 : i32
    scf.if %2 {
      %cst_10 = arith.constant 0.000000e+00 : f32
      %12 = vector.broadcast %cst_10 : f32 to vector<40x32xf32>
      %c0_11 = arith.constant 0 : index
      %c0_12 = arith.constant 0 : index
      %13 = vector.load %arg9[%c0_11, %c0_12] : memref<40x32xf32, #tpu.memory_space<vmem>>, vector<40x32xf32>
      tpu.vector_store %arg9[%c0_11, %c0_12], %12 {strides = array<i32>} : memref<40x32xf32, #tpu.memory_space<vmem>>, vector<40x32xf32>,
    } else {
    }
    %c0 = arith.constant 0 : index
    %c0_1 = arith.constant 0 : index
    %3 = vector.load %arg9[%c0, %c0_1] : memref<40x32xf32, #tpu.memory_space<vmem>>, vector<40x32xf32>
    %c0_2 = arith.constant 0 : index
    %c0_3 = arith.constant 0 : index
    %4 = vector.load %arg3[%c0_2, %c0_3] : memref<40x32xbf16, #tpu.memory_space<vmem>>, vector<40x32xbf16>
    %c0_4 = arith.constant 0 : index
    %c0_5 = arith.constant 0 : index
    %5 = vector.load %arg4[%c0_4, %c0_5] : memref<32x32xbf16, #tpu.memory_space<vmem>>, vector<32x32xbf16>
    %cst = arith.constant dense<0.000000e+00> : vector<40x32xf32>
    %6 = tpu.matmul %4, %5, %cst {dimension_numbers = #tpu.dot_dimension_numbers<[1], [0], [0], [1], [0, 0, 1, 1], [], []>} : vector<40x32xbf16>, vector<32x32xbf16>, vector<40x32xf32> -> vector<40x32xf32>
    %7 = arith.addf %3, %6 : vector<40x32xf32>
    %c0_6 = arith.constant 0 : index
    %c0_7 = arith.constant 0 : index
    %8 = vector.load %arg9[%c0_6, %c0_7] : memref<40x32xf32, #tpu.memory_space<vmem>>, vector<40x32xf32>
    tpu.vector_store %arg9[%c0_6, %c0_7], %7 {strides = array<i32>} : memref<40x32xf32, #tpu.memory_space<vmem>>, vector<40x32xf32>,
    %c0_i32_8 = arith.constant 0 : i32
    %9 = arith.cmpi eq, %arg2, %c0_i32_8 : i32
    %10 = arith.extui %9 : i1 to i32
    %c0_i32_9 = arith.constant 0 : i32
    %11 = arith.cmpi ne, %10, %c0_i32_9 : i32
    scf.if %11 {
      %c0_10 = arith.constant 0 : index
      %c0_11 = arith.constant 0 : index
      %12 = vector.load %arg9[%c0_10, %c0_11] : memref<40x32xf32, #tpu.memory_space<vmem>>, vector<40x32xf32>
      %c0_12 = arith.constant 0 : index
      %c0_13 = arith.constant 0 : index
      %13 = vector.load %arg5[%c0_12, %c0_13] : memref<1x32xf32, #tpu.memory_space<vmem>>, vector<1x32xf32>
      %14 = vector.broadcast %13 : vector<1x32xf32> to vector<40x32xf32>
      %15 = arith.addf %12, %14 : vector<40x32xf32>
      %c0_14 = arith.constant 0 : index
      %c0_15 = arith.constant 0 : index
      %16 = vector.load %arg7[%c0_14, %c0_15] : memref<40x32xbf16, #tpu.memory_space<vmem>>, vector<40x32xbf16>
      %17 = arith.extf %16 : vector<40x32xbf16> to vector<40x32xf32>
      %c0_16 = arith.constant 0 : index
      %c0_17 = arith.constant 0 : index
      %18 = vector.load %arg6[%c0_16, %c0_17] : memref<1x32xf32, #tpu.memory_space<vmem>>, vector<1x32xf32>
      %19 = vector.broadcast %18 : vector<1x32xf32> to vector<40x32xf32>
      %20 = arith.mulf %19, %15 : vector<40x32xf32>
      %21 = arith.addf %17, %20 : vector<40x32xf32>
      %22 = arith.truncf %21 : vector<40x32xf32> to vector<40x32xbf16>
      %c0_18 = arith.constant 0 : index
      %c0_19 = arith.constant 0 : index
      %23 = vector.load %arg8[%c0_18, %c0_19] : memref<40x32xbf16, #tpu.memory_space<vmem>>, vector<40x32xbf16>
      tpu.vector_store %arg8[%c0_18, %c0_19], %22 {strides = array<i32>} : memref<40x32xbf16, #tpu.memory_space<vmem>>, vector<40x32xbf16>,
    } else {
    }
    return
  }
  func.func @transform_0(%arg0: i32, %arg1: i32, %arg2: i32) -> (i32, i32) {
    %c0_i32 = arith.constant 0 : i32
    return %arg0, %arg2 : i32, i32
  }
  func.func @transform_1(%arg0: i32, %arg1: i32, %arg2: i32) -> (i32, i32) {
    %c0_i32 = arith.constant 0 : i32
    return %arg2, %arg1 : i32, i32
  }
  func.func @transform_2(%arg0: i32, %arg1: i32, %arg2: i32) -> (i32, i32) {
    %c0_i32 = arith.constant 0 : i32
    %c0_i32_0 = arith.constant 0 : i32
    return %c0_i32, %arg1 : i32, i32
  }
  func.func @transform_3(%arg0: i32, %arg1: i32, %arg2: i32) -> (i32, i32) {
    %c0_i32 = arith.constant 0 : i32
    %c0_i32_0 = arith.constant 0 : i32
    return %c0_i32, %arg1 : i32, i32
  }
  func.func @transform_4(%arg0: i32, %arg1: i32, %arg2: i32) -> (i32, i32) {
    %c0_i32 = arith.constant 0 : i32
    return %arg0, %arg1 : i32, i32
  }
  func.func @transform_5(%arg0: i32, %arg1: i32, %arg2: i32) -> (i32, i32) {
    %c0_i32 = arith.constant 0 : i32
    return %arg0, %arg1 : i32, i32
  }
}

module attributes {stable_mosaic.version = 11 : i64} {
  func.func @_layernorm_kernel(%arg0: i32, %arg1: memref<40x32xbf16, #tpu.memory_space<vmem>>, %arg2: memref<1x32xf32, #tpu.memory_space<vmem>>, %arg3: memref<1x32xf32, #tpu.memory_space<vmem>>, %arg4: memref<40x32xf32, #tpu.memory_space<vmem>>) attributes {dimension_semantics = [#tpu.dimension_semantics<parallel>], iteration_bounds = array<i64: 1>, scalar_prefetch = 0 : i64, scratch_operands = 0 : i64, tpu.core_type = #tpu.core_type<tc>, window_params = [{transform_indices = @transform_0, window_bounds = array<i64: 40, 32>}, {pipeline_mode = #tpu.pipeline_mode<synchronous>, transform_indices = @transform_1, window_bounds = array<i64: 1, 32>}, {pipeline_mode = #tpu.pipeline_mode<synchronous>, transform_indices = @transform_2, window_bounds = array<i64: 1, 32>}, {transform_indices = @transform_3, window_bounds = array<i64: 40, 32>}]} {
    %c0 = arith.constant 0 : index
    %c0_0 = arith.constant 0 : index
    %0 = vector.load %arg1[%c0, %c0_0] : memref<40x32xbf16, #tpu.memory_space<vmem>>, vector<40x32xbf16>
    %1 = arith.extf %0 : vector<40x32xbf16> to vector<40x32xf32>
    %cst = arith.constant dense<0.000000e+00> : vector<40xf32>
    %2 = vector.multi_reduction <add>, %1, %cst [1] : vector<40x32xf32> to vector<40xf32>
    %3 = vector.shape_cast %2 : vector<40xf32> to vector<40x1xf32>
    %cst_1 = arith.constant 3.200000e+01 : f32
    %4 = vector.broadcast %cst_1 : f32 to vector<40x1xf32>
    %5 = arith.divf %3, %4 : vector<40x1xf32>
    %6 = vector.broadcast %5 : vector<40x1xf32> to vector<40x32xf32>
    %7 = arith.subf %1, %6 : vector<40x32xf32>
    %8 = arith.mulf %7, %7 : vector<40x32xf32>
    %cst_2 = arith.constant dense<0.000000e+00> : vector<40xf32>
    %9 = vector.multi_reduction <add>, %8, %cst_2 [1] : vector<40x32xf32> to vector<40xf32>
    %10 = vector.shape_cast %9 : vector<40xf32> to vector<40x1xf32>
    %cst_3 = arith.constant 3.200000e+01 : f32
    %11 = vector.broadcast %cst_3 : f32 to vector<40x1xf32>
    %12 = arith.divf %10, %11 : vector<40x1xf32>
    %cst_4 = arith.constant 9.99999997E-7 : f32
    %13 = vector.broadcast %cst_4 : f32 to vector<40x1xf32>
    %14 = arith.addf %12, %13 : vector<40x1xf32>
    %15 = math.rsqrt %14 : vector<40x1xf32>
    %16 = vector.broadcast %15 : vector<40x1xf32> to vector<40x32xf32>
    %17 = arith.mulf %7, %16 : vector<40x32xf32>
    %c0_5 = arith.constant 0 : index
    %c0_6 = arith.constant 0 : index
    %18 = vector.load %arg2[%c0_5, %c0_6] : memref<1x32xf32, #tpu.memory_space<vmem>>, vector<1x32xf32>
    %19 = vector.broadcast %18 : vector<1x32xf32> to vector<40x32xf32>
    %20 = arith.mulf %17, %19 : vector<40x32xf32>
    %c0_7 = arith.constant 0 : index
    %c0_8 = arith.constant 0 : index
    %21 = vector.load %arg3[%c0_7, %c0_8] : memref<1x32xf32, #tpu.memory_space<vmem>>, vector<1x32xf32>
    %22 = vector.broadcast %21 : vector<1x32xf32> to vector<40x32xf32>
    %23 = arith.addf %20, %22 : vector<40x32xf32>
    %c0_9 = arith.constant 0 : index
    %c0_10 = arith.constant 0 : index
    %24 = vector.load %arg4[%c0_9, %c0_10] : memref<40x32xf32, #tpu.memory_space<vmem>>, vector<40x32xf32>
    tpu.vector_store %arg4[%c0_9, %c0_10], %23 {strides = array<i32>} : memref<40x32xf32, #tpu.memory_space<vmem>>, vector<40x32xf32>,
    return
  }
  func.func @transform_0(%arg0: i32) -> (i32, i32) {
    %c0_i32 = arith.constant 0 : i32
    %c0_i32_0 = arith.constant 0 : i32
    return %arg0, %c0_i32 : i32, i32
  }
  func.func @transform_1(%arg0: i32) -> (i32, i32) {
    %c0_i32 = arith.constant 0 : i32
    %c0_i32_0 = arith.constant 0 : i32
    %c0_i32_1 = arith.constant 0 : i32
    return %c0_i32, %c0_i32_0 : i32, i32
  }
  func.func @transform_2(%arg0: i32) -> (i32, i32) {
    %c0_i32 = arith.constant 0 : i32
    %c0_i32_0 = arith.constant 0 : i32
    %c0_i32_1 = arith.constant 0 : i32
    return %c0_i32, %c0_i32_0 : i32, i32
  }
  func.func @transform_3(%arg0: i32) -> (i32, i32) {
    %c0_i32 = arith.constant 0 : i32
    %c0_i32_0 = arith.constant 0 : i32
    return %arg0, %c0_i32 : i32, i32
  }
}

module attributes {stable_mosaic.version = 11 : i64} {
  func.func @_matmul_ls_res_kernel(%arg0: i32, %arg1: i32, %arg2: i32, %arg3: memref<40x128xbf16, #tpu.memory_space<vmem>>, %arg4: memref<128x32xbf16, #tpu.memory_space<vmem>>, %arg5: memref<1x32xf32, #tpu.memory_space<vmem>>, %arg6: memref<1x32xf32, #tpu.memory_space<vmem>>, %arg7: memref<40x32xbf16, #tpu.memory_space<vmem>>, %arg8: memref<40x32xbf16, #tpu.memory_space<vmem>>, %arg9: memref<40x32xf32, #tpu.memory_space<vmem>>) attributes {dimension_semantics = [#tpu.dimension_semantics<parallel>, #tpu.dimension_semantics<parallel>, #tpu.dimension_semantics<arbitrary>], iteration_bounds = array<i64: 1, 1, 1>, scalar_prefetch = 0 : i64, scratch_operands = 1 : i64, tpu.core_type = #tpu.core_type<tc>, window_params = [{transform_indices = @transform_0, window_bounds = array<i64: 40, 128>}, {transform_indices = @transform_1, window_bounds = array<i64: 128, 32>}, {transform_indices = @transform_2, window_bounds = array<i64: 1, 32>}, {transform_indices = @transform_3, window_bounds = array<i64: 1, 32>}, {transform_indices = @transform_4, window_bounds = array<i64: 40, 32>}, {transform_indices = @transform_5, window_bounds = array<i64: 40, 32>}]} {
    %c0_i32 = arith.constant 0 : i32
    %0 = arith.cmpi eq, %arg2, %c0_i32 : i32
    %1 = arith.extui %0 : i1 to i32
    %c0_i32_0 = arith.constant 0 : i32
    %2 = arith.cmpi ne, %1, %c0_i32_0 : i32
    scf.if %2 {
      %cst_10 = arith.constant 0.000000e+00 : f32
      %12 = vector.broadcast %cst_10 : f32 to vector<40x32xf32>
      %c0_11 = arith.constant 0 : index
      %c0_12 = arith.constant 0 : index
      %13 = vector.load %arg9[%c0_11, %c0_12] : memref<40x32xf32, #tpu.memory_space<vmem>>, vector<40x32xf32>
      tpu.vector_store %arg9[%c0_11, %c0_12], %12 {strides = array<i32>} : memref<40x32xf32, #tpu.memory_space<vmem>>, vector<40x32xf32>,
    } else {
    }
    %c0 = arith.constant 0 : index
    %c0_1 = arith.constant 0 : index
    %3 = vector.load %arg9[%c0, %c0_1] : memref<40x32xf32, #tpu.memory_space<vmem>>, vector<40x32xf32>
    %c0_2 = arith.constant 0 : index
    %c0_3 = arith.constant 0 : index
    %4 = vector.load %arg3[%c0_2, %c0_3] : memref<40x128xbf16, #tpu.memory_space<vmem>>, vector<40x128xbf16>
    %c0_4 = arith.constant 0 : index
    %c0_5 = arith.constant 0 : index
    %5 = vector.load %arg4[%c0_4, %c0_5] : memref<128x32xbf16, #tpu.memory_space<vmem>>, vector<128x32xbf16>
    %cst = arith.constant dense<0.000000e+00> : vector<40x32xf32>
    %6 = tpu.matmul %4, %5, %cst {dimension_numbers = #tpu.dot_dimension_numbers<[1], [0], [0], [1], [0, 0, 1, 1], [], []>} : vector<40x128xbf16>, vector<128x32xbf16>, vector<40x32xf32> -> vector<40x32xf32>
    %7 = arith.addf %3, %6 : vector<40x32xf32>
    %c0_6 = arith.constant 0 : index
    %c0_7 = arith.constant 0 : index
    %8 = vector.load %arg9[%c0_6, %c0_7] : memref<40x32xf32, #tpu.memory_space<vmem>>, vector<40x32xf32>
    tpu.vector_store %arg9[%c0_6, %c0_7], %7 {strides = array<i32>} : memref<40x32xf32, #tpu.memory_space<vmem>>, vector<40x32xf32>,
    %c0_i32_8 = arith.constant 0 : i32
    %9 = arith.cmpi eq, %arg2, %c0_i32_8 : i32
    %10 = arith.extui %9 : i1 to i32
    %c0_i32_9 = arith.constant 0 : i32
    %11 = arith.cmpi ne, %10, %c0_i32_9 : i32
    scf.if %11 {
      %c0_10 = arith.constant 0 : index
      %c0_11 = arith.constant 0 : index
      %12 = vector.load %arg9[%c0_10, %c0_11] : memref<40x32xf32, #tpu.memory_space<vmem>>, vector<40x32xf32>
      %c0_12 = arith.constant 0 : index
      %c0_13 = arith.constant 0 : index
      %13 = vector.load %arg5[%c0_12, %c0_13] : memref<1x32xf32, #tpu.memory_space<vmem>>, vector<1x32xf32>
      %14 = vector.broadcast %13 : vector<1x32xf32> to vector<40x32xf32>
      %15 = arith.addf %12, %14 : vector<40x32xf32>
      %c0_14 = arith.constant 0 : index
      %c0_15 = arith.constant 0 : index
      %16 = vector.load %arg7[%c0_14, %c0_15] : memref<40x32xbf16, #tpu.memory_space<vmem>>, vector<40x32xbf16>
      %17 = arith.extf %16 : vector<40x32xbf16> to vector<40x32xf32>
      %c0_16 = arith.constant 0 : index
      %c0_17 = arith.constant 0 : index
      %18 = vector.load %arg6[%c0_16, %c0_17] : memref<1x32xf32, #tpu.memory_space<vmem>>, vector<1x32xf32>
      %19 = vector.broadcast %18 : vector<1x32xf32> to vector<40x32xf32>
      %20 = arith.mulf %19, %15 : vector<40x32xf32>
      %21 = arith.addf %17, %20 : vector<40x32xf32>
      %22 = arith.truncf %21 : vector<40x32xf32> to vector<40x32xbf16>
      %c0_18 = arith.constant 0 : index
      %c0_19 = arith.constant 0 : index
      %23 = vector.load %arg8[%c0_18, %c0_19] : memref<40x32xbf16, #tpu.memory_space<vmem>>, vector<40x32xbf16>
      tpu.vector_store %arg8[%c0_18, %c0_19], %22 {strides = array<i32>} : memref<40x32xbf16, #tpu.memory_space<vmem>>, vector<40x32xbf16>,
    } else {
    }
    return
  }
  func.func @transform_0(%arg0: i32, %arg1: i32, %arg2: i32) -> (i32, i32) {
    %c0_i32 = arith.constant 0 : i32
    return %arg0, %arg2 : i32, i32
  }
  func.func @transform_1(%arg0: i32, %arg1: i32, %arg2: i32) -> (i32, i32) {
    %c0_i32 = arith.constant 0 : i32
    return %arg2, %arg1 : i32, i32
  }
  func.func @transform_2(%arg0: i32, %arg1: i32, %arg2: i32) -> (i32, i32) {
    %c0_i32 = arith.constant 0 : i32
    %c0_i32_0 = arith.constant 0 : i32
    return %c0_i32, %arg1 : i32, i32
  }
  func.func @transform_3(%arg0: i32, %arg1: i32, %arg2: i32) -> (i32, i32) {
    %c0_i32 = arith.constant 0 : i32
    %c0_i32_0 = arith.constant 0 : i32
    return %c0_i32, %arg1 : i32, i32
  }
  func.func @transform_4(%arg0: i32, %arg1: i32, %arg2: i32) -> (i32, i32) {
    %c0_i32 = arith.constant 0 : i32
    return %arg0, %arg1 : i32, i32
  }
  func.func @transform_5(%arg0: i32, %arg1: i32, %arg2: i32) -> (i32, i32) {
    %c0_i32 = arith.constant 0 : i32
    return %arg0, %arg1 : i32, i32
  }
}

</mosaic_0001>

<bundles_post_ra>
// kernel: model_with_intermediate_layers.23
= control target key start
LH: loop header
LB: loop body
LE: loop exit
PB: predicated region body
PF: predicated region fallthrough
CT: control target
= control target key end

     0   :  { %vm19_vm0 = vcmask 261120   ;;  %v161_v1 = vmov 0.0   ;;  %vm66_vm1 = vcmask 392192   ;;  %vm120_vm2 = vcmask 257024   ;;  %s220_s1 = inlined_call_operand.vmem [shape: bf16[48,32], index: 1, kind: input, shape index: {}]   ;;  %s221_s2 = inlined_call_operand.vmem [shape: f32[1,32], index: 2, kind: input, shape index: {}]   ;;  %s222_s0 = inlined_call_operand.vmem [shape: bf16[32,48], index: 0, kind: input, shape index: {}]   ;;  %s223_s3 = inlined_call_operand.vmem [shape: bf16[32,32], index: 3, kind: output, shape index: {}]  }
   0x1   :  { %v155_v0 = vld [vmem:[%s220_s1 + $0x10] sm:$0xff]  ;;  %20 = vst.msk [vmem:[#allocation2] sm:$0xff] %vm19_vm0, %v161_v1  ;;  %v154_v2 = vld [vmem:[%s220_s1 + $0x8] sm:$0xff]  ;;  %v153_v3 = vld [vmem:[%s220_s1] sm:$0xff] }
   0x2   :  { %21 = vst.msk [vmem:[#allocation2 + $0x8] sm:$0xff] %vm19_vm0, %v161_v1  ;;  %78 = vmatpush.bf16.msra.mxu0 %v155_v0  ;;  %156 = vmatpush.bf16.msra.mxu1 %v155_v0  ;;  %v151_v4 = vld [vmem:[%s222_s0] sm:$0xff]  ;;  %v152_v5 = vld [vmem:[%s222_s0 + $0x8] sm:$0xff] }
   0x3   :  { %22 = vst.msk [vmem:[#allocation2 + $0x10] sm:$0xff] %vm19_vm0, %v161_v1  ;;  %v160_v14 = vld [vmem:[%s221_s2] ss:$0 sm:$0xff] }
   0x4   :  { %23 = vst.msk [vmem:[#allocation2 + $0x18] sm:$0xff] %vm19_vm0, %v161_v1 }
   0x6   :  { %79 = vmatpush.bf16.msra.mxu0 %v154_v2  ;;  %157 = vmatpush.bf16.msra.mxu1 %v154_v2 }
   0x8   :  { %v24_v6 = vld [vmem:[#allocation2] sm:$0xff] }
   0x9   :  { %v25_v12 = vld [vmem:[#allocation2 + $0x8] sm:$0xff] }
   0xa   :  { %80 = vmatpush.bf16.msra.mxu0 %v153_v3  ;;  %158 = vmatpush.bf16.msra.mxu1 %v153_v3  ;;  %v26_v7 = vld [vmem:[#allocation2 + $0x10] sm:$0xff] }
   0xb   :  { %v27_v13 = vld [vmem:[#allocation2 + $0x18] sm:$0xff] }
   0xd   :  { %149 = vmatmul.msk.bf16.vlgmr.msra.gmra.mxu0 %vm66_vm1, %v151_v4  ;;  %150 = vmatmul.msk.bf16.vlgmr.msra.gmra.mxu1 %vm66_vm1, %v152_v5 }
  0x8a   :  { %v82_v8 = vpop.f32.mrf.mxu0  ;;  %v87_v9 = vpop.f32.mrf.mxu1 }
  0x8b   :  { %v92_v10 = vadd.f32 %v82_v8, %v24_v6  ;;  %v94_v11 = vadd.f32 %v87_v9, %v26_v7 }
  0x8d   :  { %97 = vst.msk [vmem:[#allocation2] sm:$0xff] %vm19_vm0, %v92_v10 }
  0x8e   :  { %99 = vst.msk [vmem:[#allocation2 + $0x10] sm:$0xff] %vm19_vm0, %v94_v11 }
  0x92   :  { %v84_v15 = vpop.f32.mrf.mxu0  ;;  %v89_v16 = vpop.f32.mrf.mxu1 }
  0x93   :  { %v93_v17 = vadd.f32 %v84_v15, %v25_v12  ;;  %v95_v18 = vadd.f32 %v89_v16, %v27_v13 }
  0x94   :  { %v104_v19 = vld [vmem:[#allocation2] sm:$0xff] }
  0x95   :  { %v112_v20 = vadd.f32 %v160_v14, %v104_v19  ;;  %v106_v21 = vld [vmem:[#allocation2 + $0x10] sm:$0xff]  ;;  %98 = vst.msk [vmem:[#allocation2 + $0x8] sm:$0xff] %vm19_vm0, %v93_v17 }
  0x96   :  { %v114_v22 = vadd.f32 %v160_v14, %v106_v21  ;;  %100 = vst.msk [vmem:[#allocation2 + $0x18] sm:$0xff] %vm19_vm0, %v95_v18 }
  0x97   :  { %v116_v23 = vpack.c.bf16 %v112_v20, %v112_v20 }
  0x98   :  { %v118_v24 = vpack.c.bf16 %v114_v22, %v114_v22 }
  0x99   :  { %121 = vst.msk [vmem:[%s223_s3] sm:$0xf] %vm120_vm2, %v116_v23 }
  0x9a   :  { %123 = vst.msk [vmem:[%s223_s3 + $0x8] sm:$0xf] %vm120_vm2, %v118_v24 }
  0x9c   :  { %v105_v25 = vld [vmem:[#allocation2 + $0x8] sm:$0xff] }
  0x9d   :  { %v113_v26 = vadd.f32 %v160_v14, %v105_v25  ;;  %v107_v27 = vld [vmem:[#allocation2 + $0x18] sm:$0xff] }
  0x9e   :  { %v115_v28 = vadd.f32 %v160_v14, %v107_v27 }
  0x9f   :  { %v117_v29 = vpack.c.bf16 %v113_v26, %v113_v26 }
  0xa0   :  { %v119_v30 = vpack.c.bf16 %v115_v28, %v115_v28 }
  0xa1   :  { %122 = vst.msk [vmem:[%s223_s3 + $0x4] sm:$0xf] %vm120_vm2, %v117_v29 }
  0xa2   :  { %124 = vst.msk [vmem:[%s223_s3 + $0xc] sm:$0xf] %vm120_vm2, %v119_v30 }

// kernel: model_with_intermediate_layers.24
= control target key start
LH: loop header
LB: loop body
LE: loop exit
PB: predicated region body
PF: predicated region fallthrough
CT: control target
= control target key end

     0   :  { %vm35_vm0 = vcmask 261120   ;;  %v320_v13 = vmov 32.0   ;;  %vm176_vm11 = vcmask 257024   ;;  %s450_s0 = inlined_call_operand.vmem [shape: bf16[40,32], index: 0, kind: input, shape index: {}]   ;;  %s451_s1 = inlined_call_operand.vmem [shape: f32[1,32], index: 1, kind: input, shape index: {}]   ;;  %s452_s2 = inlined_call_operand.vmem [shape: f32[1,32], index: 2, kind: input, shape index: {}]   ;;  %s453_s4 = inlined_call_operand.vmem [shape: f32[1,96], index: 4, kind: input, shape index: {}]   ;;  %s454_s3 = inlined_call_operand.vmem [shape: bf16[32,96], index: 3, kind: input, shape index: {}]   ;;  %s455_s5 = inlined_call_operand.vmem [shape: bf16[40,96], index: 5, kind: output, shape index: {}]  }
   0x1   :  { %v29_v0 = vld [vmem:[%s450_s0 + $0x10] sm:$0xf]  ;;  %v292_v1 = vld [vmem:[%s450_s0] sm:$0xff]   ;;  %v299_v4 = vld [vmem:[%s450_s0 + $0x8] sm:$0xff]   ;;  %308 = vrcp.f32 %v320_v13 }
   0x2   :  { %v34_v2 = vunpack.c.l.bf16 %v29_v0  ;;  %v294_v3 = vunpack.c.h.bf16 %v292_v1  ;;  %v298_v5 = vunpack.c.h.bf16 %v299_v4  ;;  %v297_v9 = vunpack.c.l.bf16 %v299_v4  ;;  %v290_v51 = vld [vmem:[%s454_s3 + $0x8] sm:$0xff]  ;;  %v289_v52 = vld [vmem:[%s454_s3] sm:$0xff] }
   0x3   :  { %v293_v10 = vunpack.c.l.bf16 %v292_v1  ;;  %301 = vmatpush.bf16.msra.mxu2 %v290_v51  ;;  %236 = vmatpush.bf16.msra.mxu0 %v290_v51 }
   0x4   :  { %v48_v6 = vsel %vm35_vm0, %v34_v2, 0.0  ;;  %v39_v7 = vsel %vm35_vm0, %v294_v3, 0.0  ;;  %v45_v8 = vsel %vm35_vm0, %v298_v5, 0.0  ;;  %v42_v11 = vsel %vm35_vm0, %v297_v9, 0.0  ;;  %300 = vmatpush.bf16.msra.mxu1 %v290_v51 }
   0x5   :  { %49 = vadd.xlane.f32.xlu0 %v48_v6  ;;  %40 = vadd.xlane.f32.xlu1 %v39_v7  ;;  %v36_v12 = vsel %vm35_vm0, %v293_v10, 0.0 }
   0x6   :  { %46 = vadd.xlane.f32.xlu2 %v45_v8 }
   0x7   :  { %v309_v14 = vpop.eup %308  ;;  %303 = vmatpush.bf16.msra.mxu2 %v289_v52  ;;  %237 = vmatpush.bf16.msra.mxu0 %v289_v52 }
   0x8   :  { %v52_v15 = vmul.f32 32.0, %v309_v14  ;;  %vm56_vm1 = vweird.f32 %v309_v14  ;;  %302 = vmatpush.bf16.msra.mxu1 %v289_v52 }
   0xa   :  { %v53_v16 = vsub.f32 1.0, %v52_v15 }
   0xc   :  { %v54_v17 = vmul.f32 %v309_v14, %v53_v16 }
   0xd   :  { %43 = vadd.xlane.f32.xlu1 %v42_v11  ;;  %37 = vadd.xlane.f32.xlu0 %v36_v12  ;;  %v305_v12 = vld [vmem:[%s451_s1] ss:$0 sm:$0xff] }
   0xe   :  { %v55_v18 = vadd.f32 %v309_v14, %v54_v17  ;;  %v306_v17 = vld [vmem:[%s452_s2] ss:$0 sm:$0xff] }
  0x10   :  { %v365_v19 = vsel %vm56_vm1, %v309_v14, %v55_v18 }
  0x78   :  { %v50_v20 = vpop.xlane.xlu0 %49  ;;  %v41_v21 = vpop.xlane.xlu1 %40 }
  0x79   :  { %v62_v22 = vmul.f32 %v365_v19, %v50_v20  ;;  %v59_v23 = vmul.f32 %v365_v19, %v41_v21  ;;  %v47_v28 = vpop.xlane.xlu2 %46 }
  0x7a   :  { %v61_v35 = vmul.f32 %v365_v19, %v47_v28 }
  0x7b   :  { %v369_v24 = vsub.f32 %v34_v2, %v62_v22  ;;  %v371_v25 = vsub.f32 %v294_v3, %v59_v23 }
  0x7c   :  { %v386_v38 = vsub.f32 %v298_v5, %v61_v35 }
  0x7d   :  { %v72_v26 = vmul.f32 %v369_v24, %v369_v24  ;;  %v69_v27 = vmul.f32 %v371_v25, %v371_v25 }
  0x7e   :  { %v71_v43 = vmul.f32 %v386_v38, %v386_v38 }
  0x7f   :  { %v85_v29 = vsel %vm35_vm0, %v72_v26, 0.0  ;;  %v76_v30 = vsel %vm35_vm0, %v69_v27, 0.0 }
  0x80   :  { %86 = vadd.xlane.f32.xlu2 %v85_v29  ;;  %77 = vadd.xlane.f32.xlu1 %v76_v30  ;;  %v44_v31 = vpop.xlane.xlu1 %43  ;;  %v38_v32 = vpop.xlane.xlu0 %37  ;;  %v82_v44 = vsel %vm35_vm0, %v71_v43, 0.0 }
  0x81   :  { %v60_v33 = vmul.f32 %v365_v19, %v44_v31  ;;  %v58_v34 = vmul.f32 %v365_v19, %v38_v32 }
  0x83   :  { %v382_v36 = vsub.f32 %v297_v9, %v60_v33  ;;  %v384_v37 = vsub.f32 %v293_v10, %v58_v34 }
  0x85   :  { %v70_v39 = vmul.f32 %v382_v36, %v382_v36  ;;  %v68_v40 = vmul.f32 %v384_v37, %v384_v37 }
  0x87   :  { %v79_v41 = vsel %vm35_vm0, %v70_v39, 0.0  ;;  %v73_v42 = vsel %vm35_vm0, %v68_v40, 0.0 }
  0x88   :  { %80 = vadd.xlane.f32.xlu2 %v79_v41  ;;  %74 = vadd.xlane.f32.xlu0 %v73_v42 }
  0x90   :  { %83 = vadd.xlane.f32.xlu0 %v82_v44 }
  0xf3   :  { %v87_v45 = vpop.xlane.xlu2 %86  ;;  %v78_v46 = vpop.xlane.xlu1 %77 }
  0xf4   :  { %v92_v47 = vmul.f32 %v87_v45, %v365_v19  ;;  %v89_v48 = vmul.f32 %v78_v46, %v365_v19 }
  0xf6   :  { %v97_v49 = vadd.f32 1e-06, %v92_v47  ;;  %v94_v50 = vadd.f32 1e-06, %v89_v48 }
  0xf8   :  { %310 = vrsqrt.f32 %v97_v49  ;;  %vm114_vm3 = vweird.f32 %v94_v50  ;;  %vm144_vm5 = vweird.f32 %v97_v49 }
  0xf9   :  { %312 = vrsqrt.f32 %v94_v50 }
  0xfb   :  { %v81_v53 = vpop.xlane.xlu2 %80  ;;  %v75_v54 = vpop.xlane.xlu0 %74 }
  0xfc   :  { %v90_v55 = vmul.f32 %v81_v53, %v365_v19  ;;  %v88_v56 = vmul.f32 %v75_v54, %v365_v19 }
  0xfe   :  { %v311_v57 = vpop.eup %310  ;;  %v95_v58 = vadd.f32 1e-06, %v90_v55  ;;  %v93_v59 = vadd.f32 1e-06, %v88_v56 }
  0xff   :  { %v313_v60 = vpop.eup %312  ;;  %v139_v61 = vmul.f32 %v311_v57, %v97_v49  ;;  %vm145_vm2 = vweird.f32 %v311_v57 }
 0x100   :  { %v109_v62 = vmul.f32 %v313_v60, %v94_v50  ;;  %314 = vrsqrt.f32 %v95_v58  ;;  %vm115_vm4 = vweird.f32 %v313_v60  ;;  %vm146_vm6 = vmor %vm144_vm5, %vm145_vm2  ;;  %vm124_vm8 = vweird.f32 %v95_v58 }
 0x101   :  { %v140_v63 = vmul.f32 %v311_v57, %v139_v61  ;;  %316 = vrsqrt.f32 %v93_v59  ;;  %vm116_vm7 = vmor %vm114_vm3, %vm115_vm4  ;;  %vm104_vm13 = vweird.f32 %v93_v59  ;;  %vm258_vm3 = vcmask 781312  }
 0x102   :  { %v110_v0 = vmul.f32 %v313_v60, %v109_v62 }
 0x103   :  { %v141_v1 = vmul.f32 0.5, %v140_v63  ;;  %v84_v2 = vpop.xlane.xlu0 %83 }
 0x104   :  { %v111_v3 = vmul.f32 0.5, %v110_v0  ;;  %v91_v4 = vmul.f32 %v84_v2, %v365_v19 }
 0x105   :  { %v142_v5 = vsub.f32 1.5, %v141_v1 }
 0x106   :  { %v315_v6 = vpop.eup %314  ;;  %v112_v7 = vsub.f32 1.5, %v111_v3  ;;  %v96_v8 = vadd.f32 1e-06, %v91_v4 }
 0x107   :  { %v317_v9 = vpop.eup %316  ;;  %v143_v10 = vmul.f32 %v311_v57, %v142_v5  ;;  %v119_v11 = vmul.f32 %v315_v6, %v95_v58  ;;  %vm125_vm9 = vweird.f32 %v315_v6 }
 0x108   :  { %v113_v13 = vmul.f32 %v313_v60, %v112_v7  ;;  %v99_v14 = vmul.f32 %v317_v9, %v93_v59  ;;  %318 = vrsqrt.f32 %v96_v8  ;;  %vm105_vm10 = vweird.f32 %v317_v9  ;;  %vm126_vm12 = vmor %vm124_vm8, %vm125_vm9 }
 0x109   :  { %v147_v15 = vsel %vm146_vm6, %v311_v57, %v143_v10  ;;  %v120_v16 = vmul.f32 %v315_v6, %v119_v11  ;;  %vm106_vm14 = vmor %vm104_vm13, %vm105_vm10  ;;  %vm134_vm1 = vweird.f32 %v96_v8 }
 0x10a   :  { %v152_v18 = vmul.f32 %v147_v15, %v369_v24  ;;  %v117_v19 = vsel %vm116_vm7, %v313_v60, %v113_v13  ;;  %v100_v20 = vmul.f32 %v317_v9, %v99_v14 }
 0x10b   :  { %v149_v21 = vmul.f32 %v117_v19, %v371_v25  ;;  %v121_v22 = vmul.f32 0.5, %v120_v16 }
 0x10c   :  { %v161_v23 = vmul.f32 %v305_v12, %v152_v18  ;;  %v101_v26 = vmul.f32 0.5, %v100_v20 }
 0x10d   :  { %v158_v27 = vmul.f32 %v305_v12, %v149_v21  ;;  %v122_v28 = vsub.f32 1.5, %v121_v22 }
 0x10e   :  { %v319_v29 = vpop.eup %318  ;;  %v170_v30 = vadd.f32 %v306_v17, %v161_v23  ;;  %v102_v31 = vsub.f32 1.5, %v101_v26 }
 0x10f   :  { %v167_v32 = vadd.f32 %v306_v17, %v158_v27  ;;  %v123_v33 = vmul.f32 %v315_v6, %v122_v28  ;;  %v129_v34 = vmul.f32 %v319_v29, %v96_v8  ;;  %vm135_vm15 = vweird.f32 %v319_v29 }
 0x110   :  { %v175_v24 = vpack.c.bf16 %v170_v30, %v170_v30  ;;  %v103_v35 = vmul.f32 %v317_v9, %v102_v31  ;;  %vm136_vm2 = vmor %vm134_vm1, %vm135_vm15 }
 0x111   :  { %v172_v25 = vpack.c.bf16 %v167_v32, %v167_v32  ;;  %v127_v39 = vsel %vm126_vm12, %v315_v6, %v123_v33  ;;  %v130_v40 = vmul.f32 %v319_v29, %v129_v34 }
 0x112   :  { %181 = vst.msk [vmem:[#allocation2 + $0x10] sm:$0xf] %vm176_vm11, %v175_v24  ;;  %v150_v41 = vmul.f32 %v127_v39, %v382_v36  ;;  %v107_v42 = vsel %vm106_vm14, %v317_v9, %v103_v35 }
 0x113   :  { %178 = vst.msk [vmem:[#allocation2 + $0x4] sm:$0xf] %vm176_vm11, %v172_v25  ;;  %v148_v43 = vmul.f32 %v107_v42, %v384_v37  ;;  %v131_v44 = vmul.f32 0.5, %v130_v40 }
 0x114   :  { %v159_v45 = vmul.f32 %v305_v12, %v150_v41 }
 0x115   :  { %v157_v46 = vmul.f32 %v305_v12, %v148_v43  ;;  %v132_v47 = vsub.f32 1.5, %v131_v44 }
 0x116   :  { %v168_v48 = vadd.f32 %v306_v17, %v159_v45 }
 0x117   :  { %v166_v49 = vadd.f32 %v306_v17, %v157_v46  ;;  %v133_v50 = vmul.f32 %v319_v29, %v132_v47 }
 0x118   :  { %v173_v51 = vpack.c.bf16 %v168_v48, %v168_v48 }
 0x119   :  { %v171_v52 = vpack.c.bf16 %v166_v49, %v166_v49  ;;  %v137_v53 = vsel %vm136_vm2, %v319_v29, %v133_v50  ;;  %v186_v54 = vld [vmem:[#allocation2 + $0x10] sm:$0xf] }
 0x11a   :  { %179 = vst.msk [vmem:[#allocation2 + $0x8] sm:$0xf] %vm176_vm11, %v173_v51  ;;  %v151_v36 = vmul.f32 %v137_v53, %v386_v38  ;;  %v204_v55 = vunpack.c.l.b16 %v186_v54  ;;  %v307_v38 = vld [vmem:[%s453_s4] ss:$0 sm:$0xff] }
 0x11b   :  { %177 = vst.msk [vmem:[#allocation2] sm:$0xf] %vm176_vm11, %v171_v52 }
 0x11c   :  { %v160_v37 = vmul.f32 %v305_v12, %v151_v36  ;;  %v207_v56 = vpack.c.b16 %v204_v55, %v204_v55 }
 0x11e   :  { %v169_v57 = vadd.f32 %v306_v17, %v160_v37  ;;  %286 = vmatmul.msk.bf16.vlgmr.msra.gmra.mxu2 %vm35_vm0, %v207_v56 }
 0x120   :  { %v174_v58 = vpack.c.bf16 %v169_v57, %v169_v57 }
 0x122   :  { %180 = vst.msk [vmem:[#allocation2 + $0xc] sm:$0xf] %vm176_vm11, %v174_v58  ;;  %v287_v59 = vld [vmem:[#allocation2] sm:$0xff] }
 0x123   :  { %284 = vmatmul.msk.bf16.vlgmr.msra.gmra.mxu0 %vm35_vm0, %v287_v59 }
 0x129   :  { %v288_v60 = vld [vmem:[#allocation2 + $0x8] sm:$0xff] }
 0x12a   :  { %285 = vmatmul.msk.bf16.vlgmr.msra.gmra.mxu1 %vm35_vm0, %v288_v60 }
 0x1a0   :  { %v239_v61 = vpop.f32.mrf.mxu0 }
 0x1a1   :  { %v249_v62 = vpop.f32.mrf.mxu2  ;;  %v240_v63 = vadd.f32 %v307_v38, %v239_v61 }
 0x1a2   :  { %v250_v0 = vadd.f32 %v307_v38, %v249_v62 }
 0x1a3   :  { %v253_v1 = vpack.c.bf16 %v240_v63, %v240_v63 }
 0x1a4   :  { %v257_v2 = vpack.c.bf16 %v250_v0, %v250_v0 }
 0x1a5   :  { %259 = vst.msk [vmem:[%s455_s5] sm:$0xf] %vm258_vm3, %v253_v1 }
 0x1a6   :  { %263 = vst.msk [vmem:[%s455_s5 + $0x10] sm:$0xf] %vm258_vm3, %v257_v2 }
 0x1a7   :  { %v244_v3 = vpop.f32.mrf.mxu1 }
 0x1a8   :  { %v241_v4 = vpop.f32.mrf.mxu0  ;;  %v245_v5 = vadd.f32 %v307_v38, %v244_v3 }
 0x1a9   :  { %v251_v6 = vpop.f32.mrf.mxu2  ;;  %v242_v7 = vadd.f32 %v307_v38, %v241_v4 }
 0x1aa   :  { %v255_v8 = vpack.c.bf16 %v245_v5, %v245_v5 }
 0x1ab   :  { %v254_v9 = vpack.c.bf16 %v242_v7, %v242_v7 }
 0x1ac   :  { %261 = vst.msk [vmem:[%s455_s5 + $0x8] sm:$0xf] %vm258_vm3, %v255_v8 }
 0x1ad   :  { %260 = vst.msk [vmem:[%s455_s5 + $0x4] sm:$0xf] %vm258_vm3, %v254_v9 }
 0x1af   :  { %v246_v10 = vpop.f32.mrf.mxu1 }
 0x1b0   :  { %v247_v11 = vadd.f32 %v307_v38, %v246_v10 }
 0x1b2   :  { %v256_v12 = vpack.c.bf16 %v247_v11, %v247_v11 }
 0x1b4   :  { %262 = vst.msk [vmem:[%s455_s5 + $0xc] sm:$0xf] %vm258_vm3, %v256_v12 }

// kernel: model_with_intermediate_layers.25
= control target key start
LH: loop header
LB: loop body
LE: loop exit
PB: predicated region body
PF: predicated region fallthrough
CT: control target
= control target key end

     0   :  { %s746_s12 = smov 0   ;;  %s748_s13 = smov 0   ;;  %s825_s0 = inlined_call_operand.vmem [shape: bf16[2,2,17,16], index: 0, kind: input, shape index: {}]   ;;  %s826_s1 = inlined_call_operand.vmem [shape: bf16[2,2,17,16], index: 1, kind: input, shape index: {}]   ;;  %s827_s2 = inlined_call_operand.vmem [shape: bf16[2,2,17,16], index: 2, kind: input, shape index: {}]   ;;  %s828_s3 = inlined_call_operand.vmem [shape: bf16[2,2,17,16], index: 3, kind: output, shape index: {}]  }
   0x1   :  { %s750_s14 = smov 0   ;;  %s752_s15 = smov 0  }
   0x2   :  { %s754_s16 = smov 0  }
   0x3 LB: > { %s22_s17 = sadd.s32 1, %s715_s14  ;;  %s25_s18 = sadd.s32 1, %s719_s15  ;;  %s723_s16 = sphi %s754_s16, %s13_s16   ;;  %s719_s15 = sphi %s752_s15, %s832_s15   ;;  %s715_s14 = sphi %s750_s14, %s831_s14   ;;  %s711_s13 = sphi %s748_s13, %s830_s13   ;;  %s707_s12 = sphi %s746_s12, %s829_s12  }
   0x4   : > { %p23_p0 = scmp.ge.s32.totalorder %s22_s17, 2  ;;  %p600_p1 = scmp.ge.s32.totalorder %s723_s16, 1 }
   0x5   : > { %p189_p2 = scmp.lt.s32.totalorder %s723_s16, 5 }
   0x6   : > { %s834_s17 = smov (%p23_p0, %s22_s17), 0  ;;  %s836_s18 = smov (!%p23_p0, %s25_s18), %s719_s15 }
   0x7   : > { %p190_p3 = pnand %p600_p1, %p189_p2  ;;  %p27_p4 = scmp.ge.s32.totalorder %s836_s18, 2 }
   0x8   : > { %p239_p5 = scmp.lt.s32.totalorder (!%p190_p3), %s711_s13, 1  ;;  %p241_p6 = scmp.lt.s32.totalorder (!%p190_p3), %s707_s12, 1 }
   0x9   : > { %s838_s18 = smov (%p27_p4, %s836_s18), 0  ;;  %193 = sbr.rel (%p190_p3) target bundleno = 457 (0x1c9), region = 32 }
   0xe   : > { %s840_s13 = smov (!%p239_p5, %s711_s13), 1  ;;  %s842_s12 = smov (!%p241_p6, %s707_s12), 1  ;;  %vm301_vm0 = vcmask 130048   ;;  %vm339_vm1 = vcmask 131072   ;;  %vm332_vm2 = vcmask 138240   ;;  %vm378_vm3 = vcmask 1040384  }
   0xf   : > { %s631_s19 = smul.u32 6, %s840_s13  ;;  %v725_v20 = vmov 0   ;;  %vm453_vm7 = vcmask 122880   ;;  %vm454_vm9 = vsmask.f32 256  ;;  %vm450_vm15 = vcmask 125952  }
  0x10   : > { %s630_s20 = smul.u32 3, %s842_s12  ;;  %v380_v21 = vsel %vm378_vm3, 65535, %v725_v20  ;;  %vm455_vm10 = vmand %vm453_vm7, %vm454_vm9 }
  0x12   : > { %s245_s21 = sadd.s32 %s631_s19, %s630_s20 }
  0x13   : > { %s776_s22 = sshll.u32 %s245_s21, 2 }
  0x14   : > { %s256_s25 = scalar_lea.vmem %s826_s1, %s776_s22  ;;  %s247_s28 = scalar_lea.vmem %s825_s0, %s776_s22 }
  0x15   : > { %v281_v0 = vld [vmem:[%s256_s25 + $0x8] sm:$0x1]  ;;  %v624_v4 = vld [vmem:[%s256_s25] sm:$0xff]  ;;  %s265_s4 = scalar_lea.vmem %s827_s2, %s776_s22  ;;  %s802_s7 = scalar_lea.vmem %s828_s3, %s776_s22 }
  0x16   : > { %v298_v1 = vunpack.c.l.b16 %v281_v0  ;;  %v278_v5 = vld [vmem:[%s247_s28 + $0x8] sm:$0x1]  ;;  %v309_v6 = vsel %vm301_vm0, %v624_v4, 0  ;;  %v623_v8 = vld [vmem:[%s247_s28] sm:$0xff] }
  0x17   : > { %v290_v7 = vunpack.c.l.b16 %v278_v5  ;;  %v284_v17 = vld [vmem:[%s265_s4 + $0x8] sm:$0x1]  ;;  %v625_v23 = vld [vmem:[%s265_s4] sm:$0xff] }
  0x18   : > { %v300_v2 = vpack.c.b16 %v298_v1, %v298_v1  ;;  %v368_v18 = vunpack.c.l.b16 %v284_v17  ;;  %v456_v59 = vld [vmem:[%s802_s7 + $0x8] sm:$0x1] }
  0x19   : > { %v292_v9 = vpack.c.b16 %v290_v7, %v290_v7 }
  0x1a   : > { %v312_v3 = vsel %vm301_vm0, %v300_v2, 0  ;;  %v370_v19 = vpack.c.b16 %v368_v18, %v368_v18 }
  0x1b   : > { %320 = vmatpush.bf16.xpose.msra.mxu0 %v312_v3  ;;  %626 = vmatpush.bf16.xpose.msra.mxu2 %v312_v3 }
  0x1c   : > { %v382_v22 = vand.u32 %v380_v21, %v370_v19 }
  0x1e   : > { %628 = vmatpush.bf16.msra.mxu3 %v382_v22  ;;  %390 = vmatpush.bf16.msra.mxu1 %v382_v22 }
  0x22   : > { %629 = vmatpush.bf16.msra.mxu3 %v625_v23  ;;  %391 = vmatpush.bf16.msra.mxu1 %v625_v23 }
  0x23   : > { %321 = vmatpush.bf16.xpose.msra.mxu0 %v309_v6  ;;  %627 = vmatpush.bf16.xpose.msra.mxu2 %v309_v6 }
  0x2a   : > { %613 = vmatmul.msk.bf16.vlgmr.msra.gmra.mxu0 %vm301_vm0, %v623_v8  ;;  %614 = vmatmul.msk.bf16.vlgmr.msra.gmra.mxu2 %vm301_vm0, %v292_v9 }
  0xa7   : > { %v323_v10 = vpop.f32.mrf.mxu0 }
  0xa8   : > { %v333_v16 = vsel %vm332_vm2, %v323_v10, -inf }
  0xad   : > { %v328_v11 = vpop.f32.mrf.mxu2 }
  0xae   : > { %v340_v12 = vsel %vm339_vm1, %v328_v11, -inf }
  0xaf   : > { %341 = vmax.xlane.f32.xlu0 %v340_v12  ;;  %v325_v13 = vpop.f32.mrf.mxu0 }
  0xb0   : > { %v336_v14 = vsel %vm332_vm2, %v325_v13, -inf }
  0xb1   : > { %337 = vmax.xlane.f32.xlu1 %v336_v14 }
  0xb5   : > { %v330_v15 = vpop.f32.mrf.mxu2 }
  0xb7   : > { %334 = vmax.xlane.f32.xlu0 %v333_v16 }
 0x122   : > { %v342_v24 = vpop.xlane.xlu0 %341 }
 0x123   : > { %v345_v25 = vsub.f32 %v328_v11, %v342_v24 }
 0x124   : > { %v338_v26 = vpop.xlane.xlu1 %337 }
 0x125   : > { %v350_v27 = vmul.f32 1.442695, %v345_v25  ;;  %v344_v28 = vsub.f32 %v325_v13, %v338_v26 }
 0x127   : > { %673 = vpow2.f32 %v350_v27  ;;  %v348_v29 = vmul.f32 1.442695, %v344_v28 }
 0x129   : > { %675 = vpow2.f32 %v348_v29 }
 0x12a   : > { %v335_v30 = vpop.xlane.xlu0 %334 }
 0x12b   : > { %v343_v31 = vsub.f32 %v323_v10, %v335_v30 }
 0x12d   : > { %v674_v32 = vpop.eup %673  ;;  %v346_v33 = vmul.f32 1.442695, %v343_v31 }
 0x12e   : > { %v358_v34 = vsel %vm339_vm1, %v674_v32, 0.0  ;;  %v362_v35 = vpack.c.bf16 %v674_v32, %v674_v32 }
 0x12f   : > { %677 = vpow2.f32 %v346_v33  ;;  %359 = vadd.xlane.f32.xlu1 %v358_v34  ;;  %v676_v36 = vpop.eup %675 }
 0x130   : > { %620 = vmatmul.msk.bf16.vlgmr.msra.gmra.mxu3 %vm332_vm2, %v362_v35  ;;  %v355_v40 = vsel %vm332_vm2, %v676_v36, 0.0 }
 0x135   : > { %v678_v37 = vpop.eup %677 }
 0x136   : > { %v352_v38 = vsel %vm332_vm2, %v678_v37, 0.0  ;;  %v361_v39 = vpack.c.bf16 %v676_v36, %v678_v37 }
 0x137   : > { %353 = vadd.xlane.f32.xlu2 %v352_v38 }
 0x138   : > { %619 = vmatmul.msk.bf16.vlgmr.msra.gmra.mxu1 %vm332_vm2, %v361_v39 }
 0x13f   : > { %356 = vadd.xlane.f32.xlu2 %v355_v40 }
 0x1a2   : > { %v360_v41 = vpop.xlane.xlu1 %359 }
 0x1a3   : > { %679 = vrcp.f32 %v360_v41  ;;  %v443_v46 = vand.u32 2147483648, %v360_v41  ;;  %v441_v48 = vand.u32 2147483647, %v360_v41  ;;  %vm437_vm5 = vweird.f32 %v360_v41 }
 0x1a5   : > { %v444_v51 = vor.u32 1.1754944e-38, %v443_v46  ;;  %vm442_vm8 = vcmp.eq.f32.partialorder %v441_v48, 8.507059e+37 }
 0x1a9   : > { %v680_v42 = vpop.eup %679 }
 0x1aa   : > { %v433_v43 = vmul.f32 %v680_v42, %v360_v41  ;;  %v354_v44 = vpop.xlane.xlu2 %353  ;;  %vm438_vm4 = vweird.f32 %v680_v42 }
 0x1ab   : > { %681 = vrcp.f32 %v354_v44  ;;  %vm439_vm6 = vmor %vm437_vm5, %vm438_vm4  ;;  %v413_v60 = vand.u32 2147483648, %v354_v44  ;;  %v411_v63 = vand.u32 2147483647, %v354_v44  ;;  %vm407_vm12 = vweird.f32 %v354_v44 }
 0x1ac   : > { %v434_v45 = vsub.f32 1.0, %v433_v43 }
 0x1ad   : > { %v414_v4 = vor.u32 1.1754944e-38, %v413_v60  ;;  %vm412_vm14 = vcmp.eq.f32.partialorder %v411_v63, 8.507059e+37 }
 0x1ae   : > { %v435_v47 = vmul.f32 %v680_v42, %v434_v45 }
 0x1b0   : > { %v436_v49 = vadd.f32 %v680_v42, %v435_v47 }
 0x1b1   : > { %v682_v50 = vpop.eup %681 }
 0x1b2   : > { %v403_v52 = vmul.f32 %v682_v50, %v354_v44  ;;  %v357_v53 = vpop.xlane.xlu2 %356  ;;  %v440_v54 = vsel %vm439_vm6, %v680_v42, %v436_v49  ;;  %vm408_vm11 = vweird.f32 %v682_v50 }
 0x1b3   : > { %683 = vrcp.f32 %v357_v53  ;;  %v398_v55 = vpop.f32.mrf.mxu3  ;;  %v445_v56 = vsel %vm442_vm8, %v444_v51, %v440_v54  ;;  %vm409_vm13 = vmor %vm407_vm12, %vm408_vm11  ;;  %v428_v11 = vand.u32 2147483648, %v357_v53  ;;  %v426_v14 = vand.u32 2147483647, %v357_v53 }
 0x1b4   : > { %v404_v57 = vsub.f32 1.0, %v403_v52  ;;  %v446_v58 = vmul.f32 %v445_v56, %v398_v55  ;;  %vm422_vm1 = vweird.f32 %v357_v53 }
 0x1b5   : > { %v393_v3 = vpop.f32.mrf.mxu1  ;;  %v429_v16 = vor.u32 1.1754944e-38, %v428_v11  ;;  %vm427_vm3 = vcmp.eq.f32.partialorder %v426_v14, 8.507059e+37 }
 0x1b6   : > { %v449_v61 = vpack.c.bf16 %v446_v58, %v446_v58  ;;  %v405_v62 = vmul.f32 %v682_v50, %v404_v57 }
 0x1b8   : > { %v457_v0 = vsel %vm455_vm10, %v449_v61, %v456_v59  ;;  %v406_v1 = vadd.f32 %v682_v50, %v405_v62 }
 0x1b9   : > { %v684_v2 = vpop.eup %683  ;;  %458 = vst [vmem:[%s802_s7 + $0x8] sm:$0x1] %v457_v0 }
 0x1ba   : > { %v418_v5 = vmul.f32 %v684_v2, %v357_v53  ;;  %v410_v6 = vsel %vm409_vm13, %v682_v50, %v406_v1  ;;  %vm423_vm0 = vweird.f32 %v684_v2 }
 0x1bb   : > { %v415_v7 = vsel %vm412_vm14, %v414_v4, %v410_v6  ;;  %v400_v8 = vpop.f32.mrf.mxu3  ;;  %vm424_vm2 = vmor %vm422_vm1, %vm423_vm0 }
 0x1bc   : > { %v419_v9 = vsub.f32 1.0, %v418_v5  ;;  %v416_v10 = vmul.f32 %v415_v7, %v393_v3 }
 0x1bd   : > { %v395_v18 = vpop.f32.mrf.mxu1 }
 0x1be   : > { %v420_v12 = vmul.f32 %v684_v2, %v419_v9  ;;  %v447_v13 = vpack.c.bf16 %v416_v10, %v416_v10 }
 0x1c0   : > { %451 = vst.msk [vmem:[%s802_s7] sm:$0xf] %vm450_vm15, %v447_v13  ;;  %v421_v15 = vadd.f32 %v684_v2, %v420_v12 }
 0x1c2   : > { %v425_v17 = vsel %vm424_vm2, %v684_v2, %v421_v15 }
 0x1c3   : > { %v430_v19 = vsel %vm427_vm3, %v429_v16, %v425_v17 }
 0x1c4   : > { %v431_v20 = vmul.f32 %v430_v19, %v395_v18 }
 0x1c6   : > { %v448_v21 = vpack.c.bf16 %v431_v20, %v431_v20 }
 0x1c8   : > { %452 = vst.msk [vmem:[%s802_s7 + $0x4] sm:$0xf] %vm450_vm15, %v448_v21 }
 0x1c9 PF: > { %s13_s16 = sadd.s32 1, %s723_s16   ;;  %s829_s12 = smov %s715_s14 }
 0x1ca   : > { %p10_p7 = scmp.ge.s32.totalorder %s13_s16, 6   ;;  %s830_s13 = smov %s719_s15 }
 0x1cb   : > { %s831_s14 = smov %s834_s17  ;;  %s832_s15 = smov %s838_s18 }
 0x1cc   :  { %12 = sbr.rel (!%p10_p7) target bundleno = 3 (0x3), region = 68 }

// kernel: model_with_intermediate_layers.26
= control target key start
LH: loop header
LB: loop body
LE: loop exit
PB: predicated region body
PF: predicated region fallthrough
CT: control target
= control target key end

     0   :  { %vm25_vm0 = vcmask 261120   ;;  %v208_v1 = vmov 0.0   ;;  %vm159_vm1 = vcmask 257024   ;;  %s302_s1 = inlined_call_operand.vmem [shape: bf16[32,32], index: 1, kind: input, shape index: {}]   ;;  %s303_s0 = inlined_call_operand.vmem [shape: bf16[40,32], index: 0, kind: input, shape index: {}]   ;;  %s304_s2 = inlined_call_operand.vmem [shape: f32[1,32], index: 2, kind: input, shape index: {}]   ;;  %s305_s3 = inlined_call_operand.vmem [shape: f32[1,32], index: 3, kind: input, shape index: {}]   ;;  %s306_s4 = inlined_call_operand.vmem [shape: bf16[40,32], index: 4, kind: input, shape index: {}]   ;;  %s307_s5 = inlined_call_operand.vmem [shape: bf16[40,32], index: 5, kind: output, shape index: {}]  }
   0x1   :  { %v191_v0 = vld [vmem:[%s302_s1 + $0x8] sm:$0xff]  ;;  %26 = vst.msk [vmem:[#allocation2] sm:$0xff] %vm25_vm0, %v208_v1  ;;  %v40_v2 = vld [vmem:[%s303_s0 + $0x10] sm:$0xf]  ;;  %v190_v3 = vld [vmem:[%s302_s1] sm:$0xff] }
   0x2   :  { %27 = vst.msk [vmem:[#allocation2 + $0x8] sm:$0xff] %vm25_vm0, %v208_v1  ;;  %86 = vmatpush.bf16.msra.mxu0 %v191_v0  ;;  %201 = vmatpush.bf16.msra.mxu1 %v191_v0  ;;  %v54_v4 = vunpack.c.l.b16 %v40_v2  ;;  %v188_v5 = vld [vmem:[%s303_s0] sm:$0xff]  ;;  %v189_v6 = vld [vmem:[%s303_s0 + $0x8] sm:$0xff]  ;;  %v134_v36 = vld [vmem:[%s306_s4 + $0x10] sm:$0xf] }
   0x3   :  { %28 = vst.msk [vmem:[#allocation2 + $0x10] sm:$0xff] %vm25_vm0, %v208_v1  ;;  %202 = vmatpush.bf16.msra.mxu2 %v191_v0  ;;  %v206_v17 = vld [vmem:[%s304_s2] ss:$0 sm:$0xff]  ;;  %v200_v24 = vld [vmem:[%s306_s4 + $0x8] sm:$0xff]   ;;  %v139_v43 = vunpack.c.l.bf16 %v134_v36 }
   0x4   :  { %29 = vst.msk [vmem:[#allocation2 + $0x18] sm:$0xff] %vm25_vm0, %v208_v1  ;;  %v57_v7 = vpack.c.b16 %v54_v4, %v54_v4  ;;  %v193_v19 = vld [vmem:[%s306_s4] sm:$0xff]   ;;  %v198_v32 = vunpack.c.l.bf16 %v200_v24  ;;  %v199_v50 = vunpack.c.h.bf16 %v200_v24 }
   0x5   :  { %30 = vst.msk [vmem:[#allocation2 + $0x20] sm:$0xff] %vm25_vm0, %v208_v1  ;;  %v207_v23 = vld [vmem:[%s305_s3] ss:$0 sm:$0xff]  ;;  %v194_v29 = vunpack.c.l.bf16 %v193_v19  ;;  %v195_v46 = vunpack.c.h.bf16 %v193_v19 }
   0x6   :  { %87 = vmatpush.bf16.msra.mxu0 %v190_v3  ;;  %203 = vmatpush.bf16.msra.mxu1 %v190_v3 }
   0x7   :  { %204 = vmatpush.bf16.msra.mxu2 %v190_v3 }
   0x8   :  { %v31_v8 = vld [vmem:[#allocation2] sm:$0xff] }
   0x9   :  { %185 = vmatmul.msk.bf16.vlgmr.msra.gmra.mxu0 %vm25_vm0, %v188_v5  ;;  %186 = vmatmul.msk.bf16.vlgmr.msra.gmra.mxu1 %vm25_vm0, %v189_v6  ;;  %v32_v15 = vld [vmem:[#allocation2 + $0x8] sm:$0xff] }
   0xa   :  { %187 = vmatmul.msk.bf16.vlgmr.msra.gmra.mxu2 %vm25_vm0, %v57_v7  ;;  %v33_v9 = vld [vmem:[#allocation2 + $0x10] sm:$0xff] }
   0xb   :  { %v34_v16 = vld [vmem:[#allocation2 + $0x18] sm:$0xff] }
   0xc   :  { %v35_v14 = vld [vmem:[#allocation2 + $0x20] sm:$0xff] }
  0x86   :  { %v89_v10 = vpop.f32.mrf.mxu0  ;;  %v94_v11 = vpop.f32.mrf.mxu1 }
  0x87   :  { %v103_v12 = vadd.f32 %v89_v10, %v31_v8  ;;  %v105_v13 = vadd.f32 %v94_v11, %v33_v9 }
  0x89   :  { %108 = vst.msk [vmem:[#allocation2] sm:$0xff] %vm25_vm0, %v103_v12 }
  0x8a   :  { %110 = vst.msk [vmem:[#allocation2 + $0x10] sm:$0xff] %vm25_vm0, %v105_v13 }
  0x8d   :  { %v99_v18 = vpop.f32.mrf.mxu2 }
  0x8e   :  { %v107_v20 = vadd.f32 %v99_v18, %v35_v14  ;;  %v91_v21 = vpop.f32.mrf.mxu0  ;;  %v96_v22 = vpop.f32.mrf.mxu1 }
  0x8f   :  { %v104_v25 = vadd.f32 %v91_v21, %v32_v15  ;;  %v106_v26 = vadd.f32 %v96_v22, %v34_v16 }
  0x90   :  { %v116_v27 = vld [vmem:[#allocation2] sm:$0xff]  ;;  %112 = vst.msk [vmem:[#allocation2 + $0x20] sm:$0xff] %vm25_vm0, %v107_v20 }
  0x91   :  { %v125_v28 = vadd.f32 %v206_v17, %v116_v27  ;;  %v118_v30 = vld [vmem:[#allocation2 + $0x10] sm:$0xff]  ;;  %109 = vst.msk [vmem:[#allocation2 + $0x8] sm:$0xff] %vm25_vm0, %v104_v25 }
  0x92   :  { %v127_v31 = vadd.f32 %v206_v17, %v118_v30  ;;  %111 = vst.msk [vmem:[#allocation2 + $0x18] sm:$0xff] %vm25_vm0, %v106_v26 }
  0x93   :  { %v144_v33 = vmul.f32 %v207_v23, %v125_v28 }
  0x94   :  { %v146_v34 = vmul.f32 %v207_v23, %v127_v31 }
  0x95   :  { %v149_v35 = vadd.f32 %v194_v29, %v144_v33  ;;  %v101_v37 = vpop.f32.mrf.mxu2 }
  0x96   :  { %v151_v38 = vadd.f32 %v198_v32, %v146_v34 }
  0x97   :  { %v154_v39 = vpack.c.bf16 %v149_v35, %v149_v35  ;;  %v120_v40 = vld [vmem:[#allocation2 + $0x20] sm:$0xff] }
  0x98   :  { %v156_v41 = vpack.c.bf16 %v151_v38, %v151_v38  ;;  %v129_v42 = vadd.f32 %v206_v17, %v120_v40  ;;  %v117_v44 = vld [vmem:[#allocation2 + $0x8] sm:$0xff] }
  0x99   :  { %160 = vst.msk [vmem:[%s307_s5] sm:$0xf] %vm159_vm1, %v154_v39  ;;  %v126_v45 = vadd.f32 %v206_v17, %v117_v44  ;;  %v119_v47 = vld [vmem:[#allocation2 + $0x18] sm:$0xff] }
  0x9a   :  { %162 = vst.msk [vmem:[%s307_s5 + $0x8] sm:$0xf] %vm159_vm1, %v156_v41  ;;  %v148_v48 = vmul.f32 %v207_v23, %v129_v42  ;;  %v128_v49 = vadd.f32 %v206_v17, %v119_v47 }
  0x9b   :  { %v145_v51 = vmul.f32 %v207_v23, %v126_v45 }
  0x9c   :  { %v153_v52 = vadd.f32 %v148_v48, %v139_v43  ;;  %v147_v53 = vmul.f32 %v207_v23, %v128_v49 }
  0x9d   :  { %v150_v54 = vadd.f32 %v195_v46, %v145_v51 }
  0x9e   :  { %v158_v55 = vpack.c.bf16 %v153_v52, %v153_v52  ;;  %v152_v56 = vadd.f32 %v199_v50, %v147_v53 }
  0x9f   :  { %v155_v57 = vpack.c.bf16 %v150_v54, %v150_v54 }
  0xa0   :  { %164 = vst.msk [vmem:[%s307_s5 + $0x10] sm:$0xf] %vm159_vm1, %v158_v55  ;;  %v157_v58 = vpack.c.bf16 %v152_v56, %v152_v56 }
  0xa1   :  { %161 = vst.msk [vmem:[%s307_s5 + $0x4] sm:$0xf] %vm159_vm1, %v155_v57 }
  0xa2   :  { %163 = vst.msk [vmem:[%s307_s5 + $0xc] sm:$0xf] %vm159_vm1, %v157_v58 }

// kernel: model_with_intermediate_layers.27
= control target key start
LH: loop header
LB: loop body
LE: loop exit
PB: predicated region body
PF: predicated region fallthrough
CT: control target
= control target key end

     0   :  { %vm35_vm0 = vcmask 261120   ;;  %v550_v13 = vmov 32.0   ;;  %vm176_vm11 = vcmask 257024   ;;  %s764_s0 = inlined_call_operand.vmem [shape: bf16[40,32], index: 0, kind: input, shape index: {}]   ;;  %s765_s1 = inlined_call_operand.vmem [shape: f32[1,32], index: 1, kind: input, shape index: {}]   ;;  %s766_s2 = inlined_call_operand.vmem [shape: f32[1,32], index: 2, kind: input, shape index: {}]   ;;  %s767_s4 = inlined_call_operand.vmem [shape: f32[1,128], index: 4, kind: input, shape index: {}]   ;;  %s768_s3 = inlined_call_operand.vmem [shape: bf16[32,128], index: 3, kind: input, shape index: {}]   ;;  %s769_s5 = inlined_call_operand.vmem [shape: bf16[40,128], index: 5, kind: output, shape index: {}]  }
   0x1   :  { %v508_v0 = vld [vmem:[%s764_s0 + $0x8] sm:$0xff]   ;;  %v491_v1 = vld [vmem:[%s764_s0] sm:$0xff]   ;;  %v29_v2 = vld [vmem:[%s764_s0 + $0x10] sm:$0xf]  ;;  %518 = vrcp.f32 %v550_v13 }
   0x2   :  { %v496_v3 = vunpack.c.l.bf16 %v508_v0  ;;  %v492_v4 = vunpack.c.l.bf16 %v491_v1  ;;  %v34_v5 = vunpack.c.l.bf16 %v29_v2  ;;  %v497_v9 = vunpack.c.h.bf16 %v508_v0  ;;  %v489_v53 = vld [vmem:[%s768_s3 + $0x8] sm:$0xff]  ;;  %v488_v61 = vld [vmem:[%s768_s3] sm:$0xff] }
   0x3   :  { %v493_v10 = vunpack.c.h.bf16 %v491_v1  ;;  %236 = vmatpush.bf16.msra.mxu0 %v489_v53  ;;  %510 = vmatpush.bf16.msra.mxu1 %v489_v53 }
   0x4   :  { %v42_v6 = vsel %vm35_vm0, %v496_v3, 0.0  ;;  %v36_v7 = vsel %vm35_vm0, %v492_v4, 0.0  ;;  %v48_v8 = vsel %vm35_vm0, %v34_v5, 0.0  ;;  %v45_v11 = vsel %vm35_vm0, %v497_v9, 0.0  ;;  %511 = vmatpush.bf16.msra.mxu2 %v489_v53 }
   0x5   :  { %43 = vadd.xlane.f32.xlu1 %v42_v6  ;;  %37 = vadd.xlane.f32.xlu0 %v36_v7  ;;  %v39_v12 = vsel %vm35_vm0, %v493_v10, 0.0 }
   0x6   :  { %49 = vadd.xlane.f32.xlu2 %v48_v8 }
   0x7   :  { %v519_v14 = vpop.eup %518  ;;  %237 = vmatpush.bf16.msra.mxu0 %v488_v61  ;;  %512 = vmatpush.bf16.msra.mxu1 %v488_v61 }
   0x8   :  { %v52_v15 = vmul.f32 32.0, %v519_v14  ;;  %vm56_vm1 = vweird.f32 %v519_v14  ;;  %513 = vmatpush.bf16.msra.mxu2 %v488_v61 }
   0xa   :  { %v53_v16 = vsub.f32 1.0, %v52_v15 }
   0xc   :  { %v54_v17 = vmul.f32 %v519_v14, %v53_v16 }
   0xd   :  { %46 = vadd.xlane.f32.xlu1 %v45_v11  ;;  %40 = vadd.xlane.f32.xlu0 %v39_v12  ;;  %v515_v12 = vld [vmem:[%s765_s1] ss:$0 sm:$0xff] }
   0xe   :  { %v55_v18 = vadd.f32 %v519_v14, %v54_v17  ;;  %v516_v17 = vld [vmem:[%s766_s2] ss:$0 sm:$0xff] }
  0x10   :  { %v595_v19 = vsel %vm56_vm1, %v519_v14, %v55_v18 }
  0x78   :  { %v44_v20 = vpop.xlane.xlu1 %43  ;;  %v38_v21 = vpop.xlane.xlu0 %37 }
  0x79   :  { %v60_v22 = vmul.f32 %v595_v19, %v44_v20  ;;  %v58_v23 = vmul.f32 %v595_v19, %v38_v21  ;;  %v50_v28 = vpop.xlane.xlu2 %49 }
  0x7a   :  { %v62_v35 = vmul.f32 %v595_v19, %v50_v28 }
  0x7b   :  { %v599_v24 = vsub.f32 %v496_v3, %v60_v22  ;;  %v601_v25 = vsub.f32 %v492_v4, %v58_v23 }
  0x7c   :  { %v616_v38 = vsub.f32 %v34_v5, %v62_v35 }
  0x7d   :  { %v70_v26 = vmul.f32 %v599_v24, %v599_v24  ;;  %v68_v27 = vmul.f32 %v601_v25, %v601_v25 }
  0x7e   :  { %v72_v43 = vmul.f32 %v616_v38, %v616_v38 }
  0x7f   :  { %v79_v29 = vsel %vm35_vm0, %v70_v26, 0.0  ;;  %v73_v30 = vsel %vm35_vm0, %v68_v27, 0.0 }
  0x80   :  { %80 = vadd.xlane.f32.xlu1 %v79_v29  ;;  %v47_v31 = vpop.xlane.xlu1 %46  ;;  %74 = vadd.xlane.f32.xlu2 %v73_v30  ;;  %v41_v32 = vpop.xlane.xlu0 %40  ;;  %v85_v44 = vsel %vm35_vm0, %v72_v43, 0.0 }
  0x81   :  { %v61_v33 = vmul.f32 %v595_v19, %v47_v31  ;;  %v59_v34 = vmul.f32 %v595_v19, %v41_v32 }
  0x83   :  { %v612_v36 = vsub.f32 %v497_v9, %v61_v33  ;;  %v614_v37 = vsub.f32 %v493_v10, %v59_v34 }
  0x85   :  { %v71_v39 = vmul.f32 %v612_v36, %v612_v36  ;;  %v69_v40 = vmul.f32 %v614_v37, %v614_v37 }
  0x87   :  { %v82_v41 = vsel %vm35_vm0, %v71_v39, 0.0  ;;  %v76_v42 = vsel %vm35_vm0, %v69_v40, 0.0 }
  0x88   :  { %83 = vadd.xlane.f32.xlu2 %v82_v41  ;;  %77 = vadd.xlane.f32.xlu0 %v76_v42 }
  0x90   :  { %86 = vadd.xlane.f32.xlu0 %v85_v44 }
  0xf3   :  { %v81_v45 = vpop.xlane.xlu1 %80  ;;  %v75_v46 = vpop.xlane.xlu2 %74 }
  0xf4   :  { %v90_v47 = vmul.f32 %v81_v45, %v595_v19  ;;  %v88_v48 = vmul.f32 %v75_v46, %v595_v19 }
  0xf6   :  { %v95_v49 = vadd.f32 1e-06, %v90_v47  ;;  %v93_v50 = vadd.f32 1e-06, %v88_v48 }
  0xf8   :  { %520 = vrsqrt.f32 %v95_v49  ;;  %vm124_vm2 = vweird.f32 %v95_v49  ;;  %vm104_vm6 = vweird.f32 %v93_v50 }
  0xf9   :  { %522 = vrsqrt.f32 %v93_v50 }
  0xfb   :  { %v84_v51 = vpop.xlane.xlu2 %83  ;;  %v78_v52 = vpop.xlane.xlu0 %77 }
  0xfc   :  { %v91_v54 = vmul.f32 %v84_v51, %v595_v19  ;;  %v89_v55 = vmul.f32 %v78_v52, %v595_v19 }
  0xfe   :  { %v521_v56 = vpop.eup %520  ;;  %v96_v57 = vadd.f32 1e-06, %v91_v54  ;;  %v634_v58 = vadd.f32 1e-06, %v89_v55 }
  0xff   :  { %v523_v59 = vpop.eup %522  ;;  %v119_v60 = vmul.f32 %v521_v56, %v95_v49  ;;  %vm125_vm3 = vweird.f32 %v521_v56 }
 0x100   :  { %v99_v62 = vmul.f32 %v523_v59, %v93_v50  ;;  %524 = vrsqrt.f32 %v96_v57  ;;  %vm105_vm4 = vweird.f32 %v523_v59  ;;  %vm126_vm5 = vmor %vm124_vm2, %vm125_vm3  ;;  %vm134_vm8 = vweird.f32 %v96_v57 }
 0x101   :  { %v120_v63 = vmul.f32 %v521_v56, %v119_v60  ;;  %526 = vrsqrt.f32 %v634_v58  ;;  %vm106_vm7 = vmor %vm104_vm6, %vm105_vm4  ;;  %vm114_vm13 = vweird.f32 %v634_v58 }
 0x102   :  { %v100_v0 = vmul.f32 %v523_v59, %v99_v62 }
 0x103   :  { %v121_v1 = vmul.f32 0.5, %v120_v63  ;;  %v87_v2 = vpop.xlane.xlu0 %86 }
 0x104   :  { %v101_v3 = vmul.f32 0.5, %v100_v0  ;;  %v92_v4 = vmul.f32 %v87_v2, %v595_v19 }
 0x105   :  { %v122_v5 = vsub.f32 1.5, %v121_v1 }
 0x106   :  { %v525_v6 = vpop.eup %524  ;;  %v102_v7 = vsub.f32 1.5, %v101_v3  ;;  %v97_v8 = vadd.f32 1e-06, %v92_v4 }
 0x107   :  { %v527_v9 = vpop.eup %526  ;;  %v123_v10 = vmul.f32 %v521_v56, %v122_v5  ;;  %v129_v11 = vmul.f32 %v525_v6, %v96_v57  ;;  %vm135_vm9 = vweird.f32 %v525_v6 }
 0x108   :  { %v103_v13 = vmul.f32 %v523_v59, %v102_v7  ;;  %v109_v14 = vmul.f32 %v527_v9, %v634_v58  ;;  %528 = vrsqrt.f32 %v97_v8  ;;  %vm115_vm10 = vweird.f32 %v527_v9  ;;  %vm136_vm12 = vmor %vm134_vm8, %vm135_vm9 }
 0x109   :  { %v127_v15 = vsel %vm126_vm5, %v521_v56, %v123_v10  ;;  %v130_v16 = vmul.f32 %v525_v6, %v129_v11  ;;  %vm116_vm14 = vmor %vm114_vm13, %vm115_vm10  ;;  %vm144_vm1 = vweird.f32 %v97_v8 }
 0x10a   :  { %v150_v18 = vmul.f32 %v127_v15, %v599_v24  ;;  %v107_v19 = vsel %vm106_vm7, %v523_v59, %v103_v13  ;;  %v110_v20 = vmul.f32 %v527_v9, %v109_v14 }
 0x10b   :  { %v148_v21 = vmul.f32 %v107_v19, %v601_v25  ;;  %v131_v22 = vmul.f32 0.5, %v130_v16 }
 0x10c   :  { %v159_v23 = vmul.f32 %v515_v12, %v150_v18  ;;  %v111_v26 = vmul.f32 0.5, %v110_v20 }
 0x10d   :  { %v157_v27 = vmul.f32 %v515_v12, %v148_v21  ;;  %v132_v28 = vsub.f32 1.5, %v131_v22 }
 0x10e   :  { %v529_v29 = vpop.eup %528  ;;  %v168_v30 = vadd.f32 %v516_v17, %v159_v23  ;;  %v112_v31 = vsub.f32 1.5, %v111_v26 }
 0x10f   :  { %v166_v32 = vadd.f32 %v516_v17, %v157_v27  ;;  %v133_v33 = vmul.f32 %v525_v6, %v132_v28  ;;  %v139_v34 = vmul.f32 %v529_v29, %v97_v8  ;;  %vm145_vm15 = vweird.f32 %v529_v29 }
 0x110   :  { %v173_v24 = vpack.c.bf16 %v168_v30, %v168_v30  ;;  %v113_v35 = vmul.f32 %v527_v9, %v112_v31  ;;  %vm146_vm2 = vmor %vm144_vm1, %vm145_vm15 }
 0x111   :  { %v171_v25 = vpack.c.bf16 %v166_v32, %v166_v32  ;;  %v137_v39 = vsel %vm136_vm12, %v525_v6, %v133_v33  ;;  %v140_v40 = vmul.f32 %v529_v29, %v139_v34 }
 0x112   :  { %179 = vst.msk [vmem:[#allocation2 + $0x8] sm:$0xf] %vm176_vm11, %v173_v24  ;;  %v151_v41 = vmul.f32 %v137_v39, %v612_v36  ;;  %v117_v42 = vsel %vm116_vm14, %v527_v9, %v113_v35 }
 0x113   :  { %177 = vst.msk [vmem:[#allocation2] sm:$0xf] %vm176_vm11, %v171_v25  ;;  %v149_v43 = vmul.f32 %v117_v42, %v614_v37  ;;  %v141_v44 = vmul.f32 0.5, %v140_v40 }
 0x114   :  { %v160_v45 = vmul.f32 %v515_v12, %v151_v41 }
 0x115   :  { %v158_v46 = vmul.f32 %v515_v12, %v149_v43  ;;  %v142_v47 = vsub.f32 1.5, %v141_v44 }
 0x116   :  { %v169_v48 = vadd.f32 %v516_v17, %v160_v45 }
 0x117   :  { %v167_v49 = vadd.f32 %v516_v17, %v158_v46  ;;  %v143_v50 = vmul.f32 %v529_v29, %v142_v47 }
 0x118   :  { %v174_v51 = vpack.c.bf16 %v169_v48, %v169_v48 }
 0x119   :  { %v172_v52 = vpack.c.bf16 %v167_v49, %v167_v49  ;;  %v147_v53 = vsel %vm146_vm2, %v529_v29, %v143_v50 }
 0x11a   :  { %180 = vst.msk [vmem:[#allocation2 + $0xc] sm:$0xf] %vm176_vm11, %v174_v51  ;;  %v152_v36 = vmul.f32 %v147_v53, %v616_v38  ;;  %v517_v38 = vld [vmem:[%s767_s4] ss:$0 sm:$0xff] }
 0x11b   :  { %178 = vst.msk [vmem:[#allocation2 + $0x4] sm:$0xf] %vm176_vm11, %v172_v52 }
 0x11c   :  { %v161_v37 = vmul.f32 %v515_v12, %v152_v36 }
 0x11e   :  { %v170_v54 = vadd.f32 %v516_v17, %v161_v37 }
 0x120   :  { %v175_v55 = vpack.c.bf16 %v170_v54, %v170_v54 }
 0x121   :  { %v487_v56 = vld [vmem:[#allocation2 + $0x8] sm:$0xff] }
 0x122   :  { %181 = vst.msk [vmem:[#allocation2 + $0x10] sm:$0xf] %vm176_vm11, %v175_v55  ;;  %v486_v57 = vld [vmem:[#allocation2] sm:$0xff]  ;;  %484 = vmatmul.msk.bf16.vlgmr.msra.gmra.mxu1 %vm35_vm0, %v487_v56 }
 0x123   :  { %483 = vmatmul.msk.bf16.vlgmr.msra.gmra.mxu0 %vm35_vm0, %v486_v57 }
 0x129   :  { %v186_v58 = vld [vmem:[#allocation2 + $0x10] sm:$0xf] }
 0x12a   :  { %v204_v59 = vunpack.c.l.b16 %v186_v58 }
 0x12c   :  { %v207_v60 = vpack.c.b16 %v204_v59, %v204_v59 }
 0x12e   :  { %485 = vmatmul.msk.bf16.vlgmr.msra.gmra.mxu2 %vm35_vm0, %v207_v60 }
 0x19f   :  { %v244_v61 = vpop.f32.mrf.mxu1 }
 0x1a0   :  { %v239_v62 = vpop.f32.mrf.mxu0  ;;  %v665_v63 = vadd.f32 %v517_v38, %v244_v61 }
 0x1a1   :  { %v667_v0 = vadd.f32 %v517_v38, %v239_v62 }
 0x1a2   :  { %v670_v1 = vmul.f32 0.70710677, %v665_v63 }
 0x1a3   :  { %v673_v2 = vmul.f32 0.70710677, %v667_v0 }
 0x1a4   :  { %v260_v3 = vand.u32 2147483647, %v670_v1 }
 0x1a5   :  { %v258_v4 = vand.u32 2147483647, %v673_v2 }
 0x1a6   :  { %v265_v5 = vmul.f32 0.3275911, %v260_v3  ;;  %v395_v23 = vsub.f32 0.0, %v260_v3 }
 0x1a7   :  { %v263_v6 = vmul.f32 0.3275911, %v258_v4  ;;  %v246_v7 = vpop.f32.mrf.mxu1  ;;  %v393_v27 = vsub.f32 0.0, %v258_v4 }
 0x1a8   :  { %v270_v8 = vadd.f32 1.0, %v265_v5  ;;  %v241_v9 = vpop.f32.mrf.mxu0  ;;  %v679_v12 = vadd.f32 %v517_v38, %v246_v7  ;;  %v400_v41 = vmul.f32 %v395_v23, %v260_v3 }
 0x1a9   :  { %v268_v10 = vadd.f32 1.0, %v263_v6  ;;  %v677_v11 = vadd.f32 %v517_v38, %v241_v9  ;;  %v398_v43 = vmul.f32 %v393_v27, %v258_v4 }
 0x1aa   :  { %530 = vrcp.f32 %v270_v8  ;;  %v685_v14 = vmul.f32 0.70710677, %v679_v12  ;;  %v312_v29 = vand.u32 2147483647, %v270_v8  ;;  %v314_v33 = vand.u32 2147483648, %v270_v8 }
 0x1ab   :  { %532 = vrcp.f32 %v268_v10  ;;  %v682_v13 = vmul.f32 0.70710677, %v677_v11  ;;  %v284_v32 = vand.u32 2147483648, %v268_v10  ;;  %v282_v39 = vand.u32 2147483647, %v268_v10 }
 0x1ac   :  { %v691_v17 = vand.u32 2147483647, %v685_v14  ;;  %vm308_vm4 = vweird.f32 %v270_v8  ;;  %vm278_vm5 = vweird.f32 %v268_v10  ;;  %v315_v44 = vor.u32 1.1754944e-38, %v314_v33 }
 0x1ad   :  { %v688_v15 = vand.u32 2147483647, %v682_v13  ;;  %v285_v46 = vor.u32 1.1754944e-38, %v284_v32  ;;  %vm313_vm8 = vcmp.eq.f32.partialorder %v312_v29, 8.507059e+37  ;;  %vm283_vm9 = vcmp.eq.f32.partialorder %v282_v39, 8.507059e+37 }
 0x1ae   :  { %v266_v26 = vmul.f32 0.3275911, %v691_v17  ;;  %v403_v55 = vmul.f32 1.442695, %v398_v43  ;;  %v407_v56 = vmul.f32 1.442695, %v400_v41 }
 0x1af   :  { %v264_v21 = vmul.f32 0.3275911, %v688_v15  ;;  %v394_v59 = vsub.f32 0.0, %v688_v15 }
 0x1b0   :  { %v531_v16 = vpop.eup %530  ;;  %v697_v34 = vadd.f32 1.0, %v266_v26 }
 0x1b1   :  { %v249_v18 = vpop.f32.mrf.mxu2  ;;  %v533_v19 = vpop.eup %532  ;;  %v304_v20 = vmul.f32 %v531_v16, %v270_v8  ;;  %v695_v30 = vadd.f32 1.0, %v264_v21  ;;  %vm309_vm0 = vweird.f32 %v531_v16 }
 0x1b2   :  { %v274_v22 = vmul.f32 %v533_v19, %v268_v10  ;;  %v700_v35 = vadd.f32 %v517_v38, %v249_v18  ;;  %vm279_vm3 = vweird.f32 %v533_v19  ;;  %vm310_vm6 = vmor %vm308_vm4, %vm309_vm0  ;;  %v327_v7 = vand.u32 2147483647, %v697_v34 }
 0x1b3   :  { %v305_v28 = vsub.f32 1.0, %v304_v20  ;;  %534 = vrcp.f32 %v695_v30  ;;  %vm280_vm7 = vmor %vm278_vm5, %vm279_vm3  ;;  %v297_v3 = vand.u32 2147483647, %v695_v30  ;;  %v299_v4 = vand.u32 2147483648, %v695_v30 }
 0x1b4   :  { %v275_v31 = vsub.f32 1.0, %v274_v22  ;;  %536 = vrcp.f32 %v697_v34  ;;  %v704_v48 = vmul.f32 0.70710677, %v700_v35  ;;  %vm293_vm12 = vweird.f32 %v695_v30 }
 0x1b5   :  { %v306_v24 = vmul.f32 %v531_v16, %v305_v28  ;;  %v396_v22 = vsub.f32 0.0, %v691_v17  ;;  %v300_v26 = vor.u32 1.1754944e-38, %v299_v4  ;;  %vm323_vm14 = vweird.f32 %v697_v34 }
 0x1b6   :  { %v276_v25 = vmul.f32 %v533_v19, %v275_v31  ;;  %v712_v36 = vand.u32 2147483647, %v704_v48  ;;  %vm298_vm15 = vcmp.eq.f32.partialorder %v297_v3, 8.507059e+37  ;;  %vm328_vm2 = vcmp.eq.f32.partialorder %v327_v7, 8.507059e+37 }
 0x1b7   :  { %v307_v40 = vadd.f32 %v531_v16, %v306_v24 }
 0x1b8   :  { %v277_v42 = vadd.f32 %v533_v19, %v276_v25  ;;  %v267_v38 = vmul.f32 0.3275911, %v712_v36 }
 0x1b9   :  { %v251_v45 = vpop.f32.mrf.mxu2  ;;  %v311_v47 = vsel %vm310_vm6, %v531_v16, %v307_v40  ;;  %v535_v51 = vpop.eup %534  ;;  %v329_v16 = vand.u32 2147483648, %v697_v34  ;;  %vm423_vm6 = vcmp.ge.f32.partialorder %v673_v2, 0.0 }
 0x1ba   :  { %v281_v49 = vsel %vm280_vm7, %v533_v19, %v277_v42  ;;  %v706_v50 = vsel %vm313_vm8, %v315_v44, %v311_v47  ;;  %v537_v37 = vpop.eup %536  ;;  %v289_v57 = vmul.f32 %v535_v51, %v695_v30  ;;  %v723_v8 = vadd.f32 1.0, %v267_v38 }
 0x1bb   :  { %v708_v52 = vsel %vm283_vm9, %v285_v46, %v281_v49  ;;  %v350_v53 = vmul.f32 1.0614054, %v706_v50  ;;  %v319_v60 = vmul.f32 %v537_v37, %v697_v34  ;;  %vm294_vm10 = vweird.f32 %v535_v51 }
 0x1bc   :  { %v348_v54 = vmul.f32 1.0614054, %v708_v52  ;;  %v290_v62 = vsub.f32 1.0, %v289_v57  ;;  %vm324_vm11 = vweird.f32 %v537_v37  ;;  %538 = vrcp.f32 %v723_v8  ;;  %vm295_vm13 = vmor %vm293_vm12, %vm294_vm10 }
 0x1bd   :  { %v355_v58 = vadd.f32 -1.4531521, %v350_v53  ;;  %v320_v6 = vsub.f32 1.0, %v319_v60  ;;  %vm325_vm1 = vmor %vm323_vm14, %vm324_vm11  ;;  %v330_v31 = vor.u32 1.1754944e-38, %v329_v16  ;;  %540 = vpow2.f32 %v403_v55 }
 0x1be   :  { %v353_v61 = vadd.f32 -1.4531521, %v348_v54  ;;  %v291_v10 = vmul.f32 %v535_v51, %v290_v62  ;;  %542 = vpow2.f32 %v407_v56  ;;  %v399_v46 = vmul.f32 %v394_v59, %v688_v15 }
 0x1bf   :  { %v360_v5 = vmul.f32 %v355_v58, %v706_v50  ;;  %v321_v19 = vmul.f32 %v537_v37, %v320_v6  ;;  %v401_v49 = vmul.f32 %v396_v22, %v691_v17  ;;  %v342_v57 = vand.u32 2147483647, %v723_v8 }
 0x1c0   :  { %v358_v9 = vmul.f32 %v353_v61, %v708_v52  ;;  %v292_v21 = vadd.f32 %v535_v51, %v291_v10  ;;  %v344_v58 = vand.u32 2147483648, %v723_v8  ;;  %v405_v15 = vmul.f32 1.442695, %v399_v46 }
 0x1c1   :  { %v365_v18 = vadd.f32 1.4214138, %v360_v5  ;;  %v322_v27 = vadd.f32 %v537_v37, %v321_v19  ;;  %v409_v62 = vmul.f32 1.442695, %v401_v49  ;;  %vm338_vm3 = vweird.f32 %v723_v8 }
 0x1c2   :  { %v363_v20 = vadd.f32 1.4214138, %v358_v9  ;;  %v296_v29 = vsel %vm295_vm13, %v535_v51, %v292_v21  ;;  %v539_v40 = vpop.eup %538  ;;  %v345_v7 = vor.u32 1.1754944e-38, %v344_v58  ;;  %vm343_vm5 = vcmp.eq.f32.partialorder %v342_v57, 8.507059e+37 }
 0x1c3   :  { %v370_v23 = vmul.f32 %v365_v18, %v706_v50  ;;  %v301_v33 = vsel %vm298_vm15, %v300_v26, %v296_v29  ;;  %v326_v24 = vsel %vm325_vm1, %v537_v37, %v322_v27  ;;  %v334_v44 = vmul.f32 %v539_v40, %v723_v8  ;;  %v541_v61 = vpop.eup %540 }
 0x1c4   :  { %v368_v28 = vmul.f32 %v363_v20, %v708_v52  ;;  %v349_v25 = vmul.f32 1.0614054, %v301_v33  ;;  %v331_v39 = vsel %vm328_vm2, %v330_v31, %v326_v24  ;;  %vm339_vm0 = vweird.f32 %v539_v40  ;;  %v543_v17 = vpop.eup %542 }
 0x1c5   :  { %v375_v32 = vadd.f32 -0.28449672, %v370_v23  ;;  %v351_v42 = vmul.f32 1.0614054, %v331_v39  ;;  %v335_v37 = vsub.f32 1.0, %v334_v44  ;;  %vm340_vm4 = vmor %vm338_vm3, %vm339_vm0  ;;  %544 = vpow2.f32 %v405_v15 }
 0x1c6   :  { %v373_v30 = vadd.f32 -0.28449672, %v368_v28  ;;  %v354_v43 = vadd.f32 -1.4531521, %v349_v25  ;;  %v397_v18 = vsub.f32 0.0, %v712_v36  ;;  %546 = vpow2.f32 %v409_v62 }
 0x1c7   :  { %v380_v41 = vmul.f32 %v375_v32, %v706_v50  ;;  %v356_v47 = vadd.f32 -1.4531521, %v351_v42  ;;  %v336_v38 = vmul.f32 %v539_v40, %v335_v37  ;;  %vm425_vm7 = vcmp.ge.f32.partialorder %v670_v1, 0.0 }
 0x1c8   :  { %v378_v34 = vmul.f32 %v373_v30, %v708_v52  ;;  %v359_v53 = vmul.f32 %v354_v43, %v301_v33  ;;  %v402_v28 = vmul.f32 %v397_v18, %v712_v36  ;;  %vm424_vm8 = vcmp.ge.f32.partialorder %v682_v13, 0.0 }
 0x1c9   :  { %v385_v45 = vadd.f32 0.2548296, %v380_v41  ;;  %v361_v55 = vmul.f32 %v356_v47, %v331_v39  ;;  %v337_v5 = vadd.f32 %v539_v40, %v336_v38  ;;  %vm426_vm9 = vcmp.ge.f32.partialorder %v685_v14, 0.0 }
 0x1ca   :  { %v383_v51 = vadd.f32 0.2548296, %v378_v34  ;;  %v364_v60 = vadd.f32 1.4214138, %v359_v53  ;;  %v411_v43 = vmul.f32 1.442695, %v402_v28 }
 0x1cb   :  { %v390_v54 = vmul.f32 %v385_v45, %v706_v50  ;;  %v366_v59 = vadd.f32 1.4214138, %v361_v55  ;;  %v341_v10 = vsel %vm340_vm4, %v539_v40, %v337_v5  ;;  %v545_v24 = vpop.eup %544  ;;  %v439_v1 = vmul.f32 0.5, %v677_v11 }
 0x1cc   :  { %v388_v56 = vmul.f32 %v383_v51, %v708_v52  ;;  %v369_v4 = vmul.f32 %v364_v60, %v301_v33  ;;  %v346_v16 = vsel %vm343_vm5, %v345_v7, %v341_v10  ;;  %v547_v40 = vpop.eup %546  ;;  %548 = vpow2.f32 %v411_v43 }
 0x1cd   :  { %v415_v50 = vmul.f32 %v543_v17, %v390_v54  ;;  %v371_v6 = vmul.f32 %v366_v59, %v331_v39  ;;  %v352_v21 = vmul.f32 1.0614054, %v346_v16  ;;  %v438_v54 = vmul.f32 0.5, %v667_v0 }
 0x1ce   :  { %v413_v3 = vmul.f32 %v541_v61, %v388_v56  ;;  %v374_v9 = vadd.f32 -0.28449672, %v369_v4  ;;  %v440_v58 = vmul.f32 0.5, %v665_v63  ;;  %v441_v56 = vmul.f32 0.5, %v679_v12 }
 0x1cf   :  { %v376_v52 = vadd.f32 -0.28449672, %v371_v6  ;;  %v420_v22 = vsub.f32 1.0, %v415_v50  ;;  %v357_v8 = vadd.f32 -1.4531521, %v352_v21  ;;  %vm427_vm10 = vcmp.ge.f32.partialorder %v704_v48, 0.0 }
 0x1d0   :  { %v418_v19 = vsub.f32 1.0, %v413_v3  ;;  %v379_v20 = vmul.f32 %v374_v9, %v301_v33  ;;  %v442_v12 = vmul.f32 0.5, %v700_v35 }
 0x1d1   :  { %v381_v23 = vmul.f32 %v376_v52, %v331_v39  ;;  %v362_v32 = vmul.f32 %v357_v8, %v346_v16  ;;  %v430_v30 = vsub.f32 0.0, %v420_v22 }
 0x1d2   :  { %v384_v26 = vadd.f32 0.2548296, %v379_v20  ;;  %v428_v29 = vsub.f32 0.0, %v418_v19  ;;  %v549_v17 = vpop.eup %548 }
 0x1d3   :  { %v386_v27 = vadd.f32 0.2548296, %v381_v23  ;;  %v367_v42 = vadd.f32 1.4214138, %v362_v32  ;;  %v435_v47 = vsel %vm425_vm7, %v420_v22, %v430_v30 }
 0x1d4   :  { %v389_v31 = vmul.f32 %v384_v26, %v301_v33  ;;  %v433_v44 = vsel %vm423_vm6, %v418_v19, %v428_v29  ;;  %v445_v53 = vadd.f32 1.0, %v435_v47 }
 0x1d5   :  { %v391_v25 = vmul.f32 %v386_v27, %v331_v39  ;;  %v372_v46 = vmul.f32 %v367_v42, %v346_v16  ;;  %v443_v51 = vadd.f32 1.0, %v433_v44 }
 0x1d6   :  { %v414_v41 = vmul.f32 %v545_v24, %v389_v31  ;;  %v450_v15 = vmul.f32 %v445_v53, %v440_v58 }
 0x1d7   :  { %v416_v34 = vmul.f32 %v547_v40, %v391_v25  ;;  %v377_v33 = vadd.f32 -0.28449672, %v372_v46  ;;  %v448_v13 = vmul.f32 %v443_v51, %v438_v54 }
 0x1d8   :  { %v419_v45 = vsub.f32 1.0, %v414_v41 }
 0x1d9   :  { %v421_v36 = vsub.f32 1.0, %v416_v34  ;;  %v382_v2 = vmul.f32 %v377_v33, %v346_v16 }
 0x1da   :  { %v429_v49 = vsub.f32 0.0, %v419_v45 }
 0x1db   :  { %v431_v39 = vsub.f32 0.0, %v421_v36  ;;  %v387_v38 = vadd.f32 0.2548296, %v382_v2 }
 0x1dc   :  { %v434_v37 = vsel %vm424_vm8, %v419_v45, %v429_v49 }
 0x1dd   :  { %v444_v55 = vadd.f32 1.0, %v434_v37  ;;  %v436_v57 = vsel %vm426_vm9, %v421_v36, %v431_v39  ;;  %v392_v62 = vmul.f32 %v387_v38, %v346_v16 }
 0x1de   :  { %v446_v60 = vadd.f32 1.0, %v436_v57 }
 0x1df   :  { %v449_v61 = vmul.f32 %v444_v55, %v439_v1  ;;  %v417_v4 = vmul.f32 %v549_v17, %v392_v62 }
 0x1e0   :  { %v451_v59 = vmul.f32 %v446_v60, %v441_v56 }
 0x1e1   :  { %v501_v14 = vpack.c.bf16 %v449_v61, %v448_v13  ;;  %v422_v63 = vsub.f32 1.0, %v417_v4 }
 0x1e2   :  { %v506_v3 = vpack.c.bf16 %v451_v59, %v450_v15 }
 0x1e3   :  { %502 = vst [vmem:[%s769_s5] sm:$0xff] %v501_v14   ;;  %v432_v0 = vsub.f32 0.0, %v422_v63 }
 0x1e4   :  { %509 = vst [vmem:[%s769_s5 + $0x8] sm:$0xff] %v506_v3  }
 0x1e5   :  { %v437_v11 = vsel %vm427_vm10, %v422_v63, %v432_v0 }
 0x1e6   :  { %v447_v5 = vadd.f32 1.0, %v437_v11 }
 0x1e8   :  { %v452_v50 = vmul.f32 %v447_v5, %v442_v12 }
 0x1ea   :  { %v457_v6 = vpack.c.bf16 %v452_v50, %v452_v50 }
 0x1ec   :  { %462 = vst [vmem:[%s769_s5 + $0x10] sm:$0xf] %v457_v6 }

// kernel: model_with_intermediate_layers.45
= control target key start
LH: loop header
LB: loop body
LE: loop exit
PB: predicated region body
PF: predicated region fallthrough
CT: control target
= control target key end

     0   :  { %vm24_vm0 = vcmask 261120   ;;  %v193_v13 = vmov 32.0   ;;  %s284_s0 = inlined_call_operand.vmem [shape: bf16[40,32], index: 0, kind: input, shape index: {}]   ;;  %s285_s1 = inlined_call_operand.vmem [shape: f32[1,32], index: 1, kind: input, shape index: {}]   ;;  %s286_s2 = inlined_call_operand.vmem [shape: f32[1,32], index: 2, kind: input, shape index: {}]   ;;  %s287_s3 = inlined_call_operand.vmem [shape: f32[40,32], index: 3, kind: output, shape index: {}]  }
   0x1   :  { %v177_v0 = vld [vmem:[%s284_s0 + $0x8] sm:$0xff]   ;;  %v170_v1 = vld [vmem:[%s284_s0] sm:$0xff]   ;;  %v18_v2 = vld [vmem:[%s284_s0 + $0x10] sm:$0xf]  ;;  %181 = vrcp.f32 %v193_v13 }
   0x2   :  { %v175_v3 = vunpack.c.l.bf16 %v177_v0  ;;  %v171_v4 = vunpack.c.l.bf16 %v170_v1  ;;  %v23_v5 = vunpack.c.l.bf16 %v18_v2  ;;  %v176_v9 = vunpack.c.h.bf16 %v177_v0 }
   0x3   :  { %v172_v10 = vunpack.c.h.bf16 %v170_v1 }
   0x4   :  { %v31_v6 = vsel %vm24_vm0, %v175_v3, 0.0  ;;  %v25_v7 = vsel %vm24_vm0, %v171_v4, 0.0  ;;  %v37_v8 = vsel %vm24_vm0, %v23_v5, 0.0  ;;  %v34_v11 = vsel %vm24_vm0, %v176_v9, 0.0 }
   0x5   :  { %32 = vadd.xlane.f32.xlu1 %v31_v6  ;;  %26 = vadd.xlane.f32.xlu0 %v25_v7  ;;  %v28_v12 = vsel %vm24_vm0, %v172_v10, 0.0 }
   0x6   :  { %38 = vadd.xlane.f32.xlu2 %v37_v8 }
   0x7   :  { %v182_v14 = vpop.eup %181 }
   0x8   :  { %v41_v15 = vmul.f32 32.0, %v182_v14  ;;  %vm45_vm1 = vweird.f32 %v182_v14 }
   0xa   :  { %v42_v16 = vsub.f32 1.0, %v41_v15  ;;  %v180_v15 = vld [vmem:[%s286_s2] ss:$0 sm:$0xff] }
   0xc   :  { %v43_v17 = vmul.f32 %v182_v14, %v42_v16 }
   0xd   :  { %35 = vadd.xlane.f32.xlu1 %v34_v11  ;;  %29 = vadd.xlane.f32.xlu0 %v28_v12 }
   0xe   :  { %v44_v18 = vadd.f32 %v182_v14, %v43_v17 }
  0x10   :  { %v46_v19 = vsel %vm45_vm1, %v182_v14, %v44_v18 }
  0x78   :  { %v33_v20 = vpop.xlane.xlu1 %32  ;;  %v27_v21 = vpop.xlane.xlu0 %26 }
  0x79   :  { %v49_v22 = vmul.f32 %v46_v19, %v33_v20  ;;  %v47_v23 = vmul.f32 %v46_v19, %v27_v21  ;;  %v39_v28 = vpop.xlane.xlu2 %38 }
  0x7a   :  { %v51_v35 = vmul.f32 %v46_v19, %v39_v28 }
  0x7b   :  { %v228_v24 = vsub.f32 %v175_v3, %v49_v22  ;;  %v230_v25 = vsub.f32 %v171_v4, %v47_v23 }
  0x7c   :  { %v242_v38 = vsub.f32 %v23_v5, %v51_v35 }
  0x7d   :  { %v59_v26 = vmul.f32 %v228_v24, %v228_v24  ;;  %v57_v27 = vmul.f32 %v230_v25, %v230_v25 }
  0x7e   :  { %v61_v43 = vmul.f32 %v242_v38, %v242_v38 }
  0x7f   :  { %v68_v29 = vsel %vm24_vm0, %v59_v26, 0.0  ;;  %v62_v30 = vsel %vm24_vm0, %v57_v27, 0.0 }
  0x80   :  { %69 = vadd.xlane.f32.xlu1 %v68_v29  ;;  %v36_v31 = vpop.xlane.xlu1 %35  ;;  %63 = vadd.xlane.f32.xlu2 %v62_v30  ;;  %v30_v32 = vpop.xlane.xlu0 %29  ;;  %v74_v44 = vsel %vm24_vm0, %v61_v43, 0.0 }
  0x81   :  { %v50_v33 = vmul.f32 %v46_v19, %v36_v31  ;;  %v48_v34 = vmul.f32 %v46_v19, %v30_v32 }
  0x83   :  { %v238_v36 = vsub.f32 %v176_v9, %v50_v33  ;;  %v240_v37 = vsub.f32 %v172_v10, %v48_v34  ;;  %v179_v10 = vld [vmem:[%s285_s1] ss:$0 sm:$0xff] }
  0x85   :  { %v60_v39 = vmul.f32 %v238_v36, %v238_v36  ;;  %v58_v40 = vmul.f32 %v240_v37, %v240_v37 }
  0x87   :  { %v71_v41 = vsel %vm24_vm0, %v60_v39, 0.0  ;;  %v65_v42 = vsel %vm24_vm0, %v58_v40, 0.0 }
  0x88   :  { %72 = vadd.xlane.f32.xlu2 %v71_v41  ;;  %66 = vadd.xlane.f32.xlu0 %v65_v42 }
  0x90   :  { %75 = vadd.xlane.f32.xlu0 %v74_v44 }
  0xf3   :  { %v70_v45 = vpop.xlane.xlu1 %69  ;;  %v64_v46 = vpop.xlane.xlu2 %63 }
  0xf4   :  { %v79_v47 = vmul.f32 %v70_v45, %v46_v19  ;;  %v77_v48 = vmul.f32 %v64_v46, %v46_v19 }
  0xf6   :  { %v84_v49 = vadd.f32 1e-06, %v79_v47  ;;  %v82_v50 = vadd.f32 1e-06, %v77_v48 }
  0xf8   :  { %183 = vrsqrt.f32 %v84_v49  ;;  %vm113_vm2 = vweird.f32 %v84_v49  ;;  %vm93_vm6 = vweird.f32 %v82_v50 }
  0xf9   :  { %185 = vrsqrt.f32 %v82_v50 }
  0xfb   :  { %v73_v51 = vpop.xlane.xlu2 %72  ;;  %v67_v52 = vpop.xlane.xlu0 %66 }
  0xfc   :  { %v80_v53 = vmul.f32 %v73_v51, %v46_v19  ;;  %v78_v54 = vmul.f32 %v67_v52, %v46_v19 }
  0xfe   :  { %v184_v55 = vpop.eup %183  ;;  %v85_v56 = vadd.f32 1e-06, %v80_v53  ;;  %v83_v57 = vadd.f32 1e-06, %v78_v54 }
  0xff   :  { %v186_v58 = vpop.eup %185  ;;  %v108_v59 = vmul.f32 %v184_v55, %v84_v49  ;;  %vm114_vm3 = vweird.f32 %v184_v55 }
 0x100   :  { %v88_v60 = vmul.f32 %v186_v58, %v82_v50  ;;  %187 = vrsqrt.f32 %v85_v56  ;;  %vm94_vm4 = vweird.f32 %v186_v58  ;;  %vm115_vm5 = vmor %vm113_vm2, %vm114_vm3  ;;  %vm123_vm8 = vweird.f32 %v85_v56 }
 0x101   :  { %v109_v61 = vmul.f32 %v184_v55, %v108_v59  ;;  %189 = vrsqrt.f32 %v83_v57  ;;  %vm95_vm7 = vmor %vm93_vm6, %vm94_vm4  ;;  %vm103_vm12 = vweird.f32 %v83_v57 }
 0x102   :  { %v89_v62 = vmul.f32 %v186_v58, %v88_v60 }
 0x103   :  { %v110_v63 = vmul.f32 0.5, %v109_v61  ;;  %v76_v0 = vpop.xlane.xlu0 %75 }
 0x104   :  { %v90_v1 = vmul.f32 0.5, %v89_v62  ;;  %v81_v2 = vmul.f32 %v76_v0, %v46_v19 }
 0x105   :  { %v111_v3 = vsub.f32 1.5, %v110_v63 }
 0x106   :  { %v188_v4 = vpop.eup %187  ;;  %v91_v5 = vsub.f32 1.5, %v90_v1  ;;  %v86_v6 = vadd.f32 1e-06, %v81_v2 }
 0x107   :  { %v190_v7 = vpop.eup %189  ;;  %v112_v8 = vmul.f32 %v184_v55, %v111_v3  ;;  %v118_v9 = vmul.f32 %v188_v4, %v85_v56  ;;  %vm124_vm9 = vweird.f32 %v188_v4 }
 0x108   :  { %v92_v11 = vmul.f32 %v186_v58, %v91_v5  ;;  %v98_v12 = vmul.f32 %v190_v7, %v83_v57  ;;  %191 = vrsqrt.f32 %v86_v6  ;;  %vm104_vm10 = vweird.f32 %v190_v7  ;;  %vm125_vm11 = vmor %vm123_vm8, %vm124_vm9 }
 0x109   :  { %v116_v13 = vsel %vm115_vm5, %v184_v55, %v112_v8  ;;  %v119_v14 = vmul.f32 %v188_v4, %v118_v9  ;;  %vm105_vm13 = vmor %vm103_vm12, %vm104_vm10  ;;  %vm133_vm15 = vweird.f32 %v86_v6 }
 0x10a   :  { %v139_v16 = vmul.f32 %v116_v13, %v228_v24  ;;  %v96_v17 = vsel %vm95_vm7, %v186_v58, %v92_v11  ;;  %v99_v18 = vmul.f32 %v190_v7, %v98_v12 }
 0x10b   :  { %v137_v19 = vmul.f32 %v96_v17, %v230_v25  ;;  %v120_v20 = vmul.f32 0.5, %v119_v14 }
 0x10c   :  { %v148_v21 = vmul.f32 %v179_v10, %v139_v16  ;;  %v100_v22 = vmul.f32 0.5, %v99_v18 }
 0x10d   :  { %v146_v23 = vmul.f32 %v179_v10, %v137_v19  ;;  %v121_v26 = vsub.f32 1.5, %v120_v20 }
 0x10e   :  { %v192_v27 = vpop.eup %191  ;;  %v157_v28 = vadd.f32 %v180_v15, %v148_v21  ;;  %v101_v29 = vsub.f32 1.5, %v100_v22 }
 0x10f   :  { %v155_v30 = vadd.f32 %v180_v15, %v146_v23  ;;  %v122_v31 = vmul.f32 %v188_v4, %v121_v26  ;;  %v128_v32 = vmul.f32 %v192_v27, %v86_v6  ;;  %vm134_vm14 = vweird.f32 %v192_v27 }
 0x110   :  { %162 = vst.msk [vmem:[%s287_s3 + $0x10] sm:$0xff] %vm24_vm0, %v157_v28  ;;  %v102_v24 = vmul.f32 %v190_v7, %v101_v29  ;;  %vm135_vm1 = vmor %vm133_vm15, %vm134_vm14 }
 0x111   :  { %160 = vst.msk [vmem:[%s287_s3] sm:$0xff] %vm24_vm0, %v155_v30  ;;  %v126_v25 = vsel %vm125_vm11, %v188_v4, %v122_v31  ;;  %v129_v33 = vmul.f32 %v192_v27, %v128_v32 }
 0x112   :  { %v140_v34 = vmul.f32 %v126_v25, %v238_v36  ;;  %v106_v35 = vsel %vm105_vm13, %v190_v7, %v102_v24 }
 0x113   :  { %v138_v39 = vmul.f32 %v106_v35, %v240_v37  ;;  %v130_v40 = vmul.f32 0.5, %v129_v33 }
 0x114   :  { %v149_v41 = vmul.f32 %v179_v10, %v140_v34 }
 0x115   :  { %v147_v42 = vmul.f32 %v179_v10, %v138_v39  ;;  %v131_v43 = vsub.f32 1.5, %v130_v40 }
 0x116   :  { %v158_v44 = vadd.f32 %v180_v15, %v149_v41 }
 0x117   :  { %v156_v45 = vadd.f32 %v180_v15, %v147_v42  ;;  %v132_v46 = vmul.f32 %v192_v27, %v131_v43 }
 0x118   :  { %163 = vst.msk [vmem:[%s287_s3 + $0x18] sm:$0xff] %vm24_vm0, %v158_v44 }
 0x119   :  { %161 = vst.msk [vmem:[%s287_s3 + $0x8] sm:$0xff] %vm24_vm0, %v156_v45  ;;  %v136_v36 = vsel %vm135_vm1, %v192_v27, %v132_v46 }
 0x11a   :  { %v141_v37 = vmul.f32 %v136_v36, %v242_v38 }
 0x11c   :  { %v150_v47 = vmul.f32 %v179_v10, %v141_v37 }
 0x11e   :  { %v159_v48 = vadd.f32 %v180_v15, %v150_v47 }
 0x120   :  { %164 = vst.msk [vmem:[%s287_s3 + $0x20] sm:$0xff] %vm24_vm0, %v159_v48 }

// kernel: model_with_intermediate_layers.28
= control target key start
LH: loop header
LB: loop body
LE: loop exit
PB: predicated region body
PF: predicated region fallthrough
CT: control target
= control target key end

     0   :  { %vm24_vm0 = vcmask 261120   ;;  %v288_v2 = vmov 0.0   ;;  %vm200_vm1 = vcmask 257024   ;;  %s397_s1 = inlined_call_operand.vmem [shape: bf16[128,32], index: 1, kind: input, shape index: {}]   ;;  %s398_s2 = inlined_call_operand.vmem [shape: f32[1,32], index: 2, kind: input, shape index: {}]   ;;  %s399_s3 = inlined_call_operand.vmem [shape: f32[1,32], index: 3, kind: input, shape index: {}]   ;;  %s400_s0 = inlined_call_operand.vmem [shape: bf16[40,128], index: 0, kind: input, shape index: {}]   ;;  %s401_s4 = inlined_call_operand.vmem [shape: bf16[40,32], index: 4, kind: input, shape index: {}]   ;;  %s402_s5 = inlined_call_operand.vmem [shape: bf16[40,32], index: 5, kind: output, shape index: {}]  }
   0x1   :  { %v259_v0 = vld [vmem:[%s397_s1 + $0x38] sm:$0xff]  ;;  %v258_v1 = vld [vmem:[%s397_s1 + $0x30] sm:$0xff]  ;;  %25 = vst.msk [vmem:[#allocation2] sm:$0xff] %vm24_vm0, %v288_v2  ;;  %v257_v3 = vld [vmem:[%s397_s1 + $0x28] sm:$0xff] }
   0x2   :  { %120 = vmatpush.bf16.msra.mxu0 %v259_v0  ;;  %269 = vmatpush.bf16.msra.mxu1 %v259_v0  ;;  %26 = vst.msk [vmem:[#allocation2 + $0x8] sm:$0xff] %vm24_vm0, %v288_v2  ;;  %v256_v4 = vld [vmem:[%s397_s1 + $0x20] sm:$0xff]  ;;  %v255_v5 = vld [vmem:[%s397_s1 + $0x18] sm:$0xff]  ;;  %v254_v6 = vld [vmem:[%s397_s1 + $0x10] sm:$0xff] }
   0x3   :  { %270 = vmatpush.bf16.msra.mxu2 %v259_v0  ;;  %27 = vst.msk [vmem:[#allocation2 + $0x10] sm:$0xff] %vm24_vm0, %v288_v2  ;;  %v253_v7 = vld [vmem:[%s397_s1 + $0x8] sm:$0xff]  ;;  %v39_v8 = vld [vmem:[%s400_s0 + $0x10] sm:$0xf]  ;;  %v252_v9 = vld [vmem:[%s397_s1] sm:$0xff] }
   0x4   :  { %28 = vst.msk [vmem:[#allocation2 + $0x18] sm:$0xff] %vm24_vm0, %v288_v2  ;;  %v65_v10 = vunpack.c.l.b16 %v39_v8  ;;  %v250_v11 = vld [vmem:[%s400_s0] sm:$0xff]  ;;  %v251_v12 = vld [vmem:[%s400_s0 + $0x8] sm:$0xff]  ;;  %v175_v42 = vld [vmem:[%s401_s4 + $0x10] sm:$0xf] }
   0x5   :  { %29 = vst.msk [vmem:[#allocation2 + $0x20] sm:$0xff] %vm24_vm0, %v288_v2  ;;  %v286_v23 = vld [vmem:[%s398_s2] ss:$0 sm:$0xff]  ;;  %v268_v30 = vld [vmem:[%s401_s4 + $0x8] sm:$0xff]   ;;  %v180_v49 = vunpack.c.l.bf16 %v175_v42 }
   0x6   :  { %121 = vmatpush.bf16.msra.mxu0 %v258_v1  ;;  %271 = vmatpush.bf16.msra.mxu1 %v258_v1  ;;  %v68_v13 = vpack.c.b16 %v65_v10, %v65_v10  ;;  %v261_v25 = vld [vmem:[%s401_s4] sm:$0xff]   ;;  %v266_v38 = vunpack.c.l.bf16 %v268_v30  ;;  %v267_v56 = vunpack.c.h.bf16 %v268_v30 }
   0x7   :  { %272 = vmatpush.bf16.msra.mxu2 %v258_v1  ;;  %v287_v29 = vld [vmem:[%s399_s3] ss:$0 sm:$0xff]  ;;  %v262_v35 = vunpack.c.l.bf16 %v261_v25  ;;  %v263_v52 = vunpack.c.h.bf16 %v261_v25 }
   0x8   :  { %v30_v14 = vld [vmem:[#allocation2] sm:$0xff] }
   0x9   :  { %v31_v21 = vld [vmem:[#allocation2 + $0x8] sm:$0xff] }
   0xa   :  { %122 = vmatpush.bf16.msra.mxu0 %v257_v3  ;;  %273 = vmatpush.bf16.msra.mxu1 %v257_v3  ;;  %v32_v15 = vld [vmem:[#allocation2 + $0x10] sm:$0xff] }
   0xb   :  { %274 = vmatpush.bf16.msra.mxu2 %v257_v3  ;;  %v33_v22 = vld [vmem:[#allocation2 + $0x18] sm:$0xff] }
   0xc   :  { %v34_v20 = vld [vmem:[#allocation2 + $0x20] sm:$0xff] }
   0xe   :  { %123 = vmatpush.bf16.msra.mxu0 %v256_v4  ;;  %275 = vmatpush.bf16.msra.mxu1 %v256_v4 }
   0xf   :  { %276 = vmatpush.bf16.msra.mxu2 %v256_v4 }
  0x12   :  { %124 = vmatpush.bf16.msra.mxu0 %v255_v5  ;;  %277 = vmatpush.bf16.msra.mxu1 %v255_v5 }
  0x13   :  { %278 = vmatpush.bf16.msra.mxu2 %v255_v5 }
  0x16   :  { %125 = vmatpush.bf16.msra.mxu0 %v254_v6  ;;  %279 = vmatpush.bf16.msra.mxu1 %v254_v6 }
  0x17   :  { %280 = vmatpush.bf16.msra.mxu2 %v254_v6 }
  0x1a   :  { %126 = vmatpush.bf16.msra.mxu0 %v253_v7  ;;  %281 = vmatpush.bf16.msra.mxu1 %v253_v7 }
  0x1b   :  { %282 = vmatpush.bf16.msra.mxu2 %v253_v7 }
  0x1e   :  { %127 = vmatpush.bf16.msra.mxu0 %v252_v9  ;;  %283 = vmatpush.bf16.msra.mxu1 %v252_v9 }
  0x1f   :  { %284 = vmatpush.bf16.msra.mxu2 %v252_v9 }
  0x21   :  { %128 = vmatmul.bf16.vlgmr.msra.gmra.mxu0 %v250_v11  ;;  %133 = vmatmul.bf16.vlgmr.msra.gmra.mxu1 %v251_v12 }
  0x22   :  { %138 = vmatmul.bf16.vlgmr.msra.gmra.mxu2 %v68_v13 }
  0x9e   :  { %v129_v16 = vpop.f32.mrf.mxu0  ;;  %v134_v17 = vpop.f32.mrf.mxu1 }
  0x9f   :  { %v143_v18 = vadd.f32 %v129_v16, %v30_v14  ;;  %v145_v19 = vadd.f32 %v134_v17, %v32_v15 }
  0xa1   :  { %149 = vst.msk [vmem:[#allocation2] sm:$0xff] %vm24_vm0, %v143_v18 }
  0xa2   :  { %151 = vst.msk [vmem:[#allocation2 + $0x10] sm:$0xff] %vm24_vm0, %v145_v19 }
  0xa5   :  { %v139_v24 = vpop.f32.mrf.mxu2 }
  0xa6   :  { %v147_v26 = vadd.f32 %v139_v24, %v34_v20  ;;  %v131_v27 = vpop.f32.mrf.mxu0  ;;  %v136_v28 = vpop.f32.mrf.mxu1 }
  0xa7   :  { %v144_v31 = vadd.f32 %v131_v27, %v31_v21  ;;  %v146_v32 = vadd.f32 %v136_v28, %v33_v22 }
  0xa8   :  { %v157_v33 = vld [vmem:[#allocation2] sm:$0xff]  ;;  %153 = vst.msk [vmem:[#allocation2 + $0x20] sm:$0xff] %vm24_vm0, %v147_v26 }
  0xa9   :  { %v166_v34 = vadd.f32 %v286_v23, %v157_v33  ;;  %v159_v36 = vld [vmem:[#allocation2 + $0x10] sm:$0xff]  ;;  %150 = vst.msk [vmem:[#allocation2 + $0x8] sm:$0xff] %vm24_vm0, %v144_v31 }
  0xaa   :  { %v168_v37 = vadd.f32 %v286_v23, %v159_v36  ;;  %152 = vst.msk [vmem:[#allocation2 + $0x18] sm:$0xff] %vm24_vm0, %v146_v32 }
  0xab   :  { %v185_v39 = vmul.f32 %v287_v29, %v166_v34 }
  0xac   :  { %v187_v40 = vmul.f32 %v287_v29, %v168_v37 }
  0xad   :  { %v190_v41 = vadd.f32 %v262_v35, %v185_v39  ;;  %v141_v43 = vpop.f32.mrf.mxu2 }
  0xae   :  { %v192_v44 = vadd.f32 %v266_v38, %v187_v40 }
  0xaf   :  { %v195_v45 = vpack.c.bf16 %v190_v41, %v190_v41  ;;  %v161_v46 = vld [vmem:[#allocation2 + $0x20] sm:$0xff] }
  0xb0   :  { %v197_v47 = vpack.c.bf16 %v192_v44, %v192_v44  ;;  %v170_v48 = vadd.f32 %v286_v23, %v161_v46  ;;  %v158_v50 = vld [vmem:[#allocation2 + $0x8] sm:$0xff] }
  0xb1   :  { %201 = vst.msk [vmem:[%s402_s5] sm:$0xf] %vm200_vm1, %v195_v45  ;;  %v167_v51 = vadd.f32 %v286_v23, %v158_v50  ;;  %v160_v53 = vld [vmem:[#allocation2 + $0x18] sm:$0xff] }
  0xb2   :  { %203 = vst.msk [vmem:[%s402_s5 + $0x8] sm:$0xf] %vm200_vm1, %v197_v47  ;;  %v189_v54 = vmul.f32 %v287_v29, %v170_v48  ;;  %v169_v55 = vadd.f32 %v286_v23, %v160_v53 }
  0xb3   :  { %v186_v57 = vmul.f32 %v287_v29, %v167_v51 }
  0xb4   :  { %v194_v58 = vadd.f32 %v189_v54, %v180_v49  ;;  %v188_v59 = vmul.f32 %v287_v29, %v169_v55 }
  0xb5   :  { %v191_v60 = vadd.f32 %v263_v52, %v186_v57 }
  0xb6   :  { %v199_v61 = vpack.c.bf16 %v194_v58, %v194_v58  ;;  %v193_v62 = vadd.f32 %v267_v56, %v188_v59 }
  0xb7   :  { %v196_v63 = vpack.c.bf16 %v191_v60, %v191_v60 }
  0xb8   :  { %205 = vst.msk [vmem:[%s402_s5 + $0x10] sm:$0xf] %vm200_vm1, %v199_v61  ;;  %v198_v0 = vpack.c.bf16 %v193_v62, %v193_v62 }
  0xb9   :  { %202 = vst.msk [vmem:[%s402_s5 + $0x4] sm:$0xf] %vm200_vm1, %v196_v63 }
  0xba   :  { %204 = vst.msk [vmem:[%s402_s5 + $0xc] sm:$0xf] %vm200_vm1, %v198_v0 }

</bundles_post_ra>
